<compile_context>
chip_gen: v7x
topology: tpu7x:2x2x1
jax: 0.10.0
libtpu: 0.0.40
codegen_flags: <defaults>
</compile_context>

<pallas_src>
import jax
import jax.numpy as jnp
from jax import lax
from jax.experimental import pallas as pl
from jax.experimental.pallas import tpu as pltpu

HIDDEN = 768
EPS = 1e-12
_INV_SQRT2 = 0.7071067811865476


def _round_up(x, m):
    return ((x + m - 1) // m) * m


def _mlp_kernel(x_ref, w_ref, b_ref, g_ref, beta_ref, o_ref):
    # x_ref: (tm, 768), w_ref: (768, 768) already transposed (in, out),
    # b/g/beta: (1, 768), o_ref: (tm, 768)

    # MXU matmul in native operand dtype (bf16 fast path when inputs are bf16),
    # f32 accumulation for accuracy.
    h = jnp.dot(x_ref[...], w_ref[...], preferred_element_type=jnp.float32)
    h = h + b_ref[...].astype(jnp.float32)

    # Exact GELU (torch nn.GELU default, approximate='none')
    h = 0.5 * h * (1.0 + lax.erf(h * jnp.float32(_INV_SQRT2)))

    # LayerNorm over hidden axis, eps=1e-12, all stats in f32
    mean = jnp.mean(h, axis=-1, keepdims=True)
    centered = h - mean
    var = jnp.mean(centered * centered, axis=-1, keepdims=True)
    hn = centered * lax.rsqrt(var + jnp.float32(EPS))

    out = hn * g_ref[...].astype(jnp.float32) + beta_ref[...].astype(jnp.float32)
    o_ref[...] = out.astype(o_ref.dtype)


def mlp_forward(hidden_states, w_t, b, gamma, beta, *, tm=512):
    """Fused dense -> GELU -> LayerNorm.

    hidden_states: (..., 768)
    w_t:           (768, 768)  weight ALREADY transposed to (in, out) layout
                   (store it this way once at init; do not transpose per call)
    b, gamma, beta: (768,)
    """
    orig_shape = hidden_states.shape
    x = hidden_states.reshape(-1, HIDDEN)
    M = x.shape[0]

    # Sublane alignment for the row tile: 8 rows for 4-byte dtypes, 16 for bf16.
    itemsize = jnp.dtype(x.dtype).itemsize
    align = 8 if itemsize >= 4 else (16 if itemsize == 2 else 32)

    # Effective row tile: never bigger than (padded) M; if everything fits in a
    # single tile but can be split, split into >=2 grid steps so the "parallel"
    # axis can be sharded across v7x's two TensorCores.
    tm_eff = min(tm, _round_up(M, align))
    if pl.cdiv(M, tm_eff) == 1 and tm_eff > align:
        tm_eff = _round_up(pl.cdiv(M, 2), align)

    grid_m = pl.cdiv(M, tm_eff)
    m_pad = grid_m * tm_eff
    if m_pad != M:
        x = jnp.pad(x, ((0, m_pad - M), (0, 0)))

    b2 = b.reshape(1, HIDDEN)
    g2 = gamma.reshape(1, HIDDEN)
    beta2 = beta.reshape(1, HIDDEN)

    out = pl.pallas_call(
        _mlp_kernel,
        out_shape=jax.ShapeDtypeStruct((m_pad, HIDDEN), hidden_states.dtype),
        grid_spec=pltpu.PrefetchScalarGridSpec(
            num_scalar_prefetch=0,
            grid=(grid_m,),
            in_specs=[
                pl.BlockSpec((tm_eff, HIDDEN), lambda i: (i, 0)),      # x rows
                pl.BlockSpec((HIDDEN, HIDDEN), lambda i: (0, 0)),      # W^T (resident)
                pl.BlockSpec((1, HIDDEN), lambda i: (0, 0)),           # bias
                pl.BlockSpec((1, HIDDEN), lambda i: (0, 0)),           # LN gamma
                pl.BlockSpec((1, HIDDEN), lambda i: (0, 0)),           # LN beta
            ],
            out_specs=pl.BlockSpec((tm_eff, HIDDEN), lambda i: (i, 0)),
        ),
        compiler_params=pltpu.CompilerParams(
            dimension_semantics=("parallel",),
        ),
    )(x, w_t, b2, g2, beta2)

    if m_pad != M:
        out = out[:M]
    return out.reshape(orig_shape)


def _reference(x, w, b, gamma, beta):
    # w is torch-style (out, in)
    h = jnp.einsum("...i,oi->...o", x.astype(jnp.float32), w.astype(jnp.float32)) + b
    h = 0.5 * h * (1.0 + lax.erf(h / jnp.sqrt(2.0)))
    mean = jnp.mean(h, axis=-1, keepdims=True)
    var = jnp.mean((h - mean) ** 2, axis=-1, keepdims=True)
    hn = (h - mean) * lax.rsqrt(var + EPS)
    return hn * gamma + beta


if __name__ == "__main__":
    key = jax.random.PRNGKey(0)
    k_x, k_w, k_b, k_g, k_be = jax.random.split(key, 5)

    batch, seq = 2, 8
    x = jax.random.normal(k_x, (batch, seq, HIDDEN), dtype=jnp.float32)

    # Deterministic synthetic parameters (torch Linear stores W as (out, in)).
    w = jax.random.normal(k_w, (HIDDEN, HIDDEN), dtype=jnp.float32) * 0.02
    b = jax.random.normal(k_b, (HIDDEN,), dtype=jnp.float32) * 0.02
    gamma = 1.0 + 0.01 * jax.random.normal(k_g, (HIDDEN,), dtype=jnp.float32)
    beta = 0.01 * jax.random.normal(k_be, (HIDDEN,), dtype=jnp.float32)

    # Pre-transpose the weight ONCE (parameter-setup time), not per call.
    w_t = jnp.asarray(w.T)

    # f32 path
    out = mlp_forward(x, w_t, b, gamma, beta)
    out = jax.block_until_ready(out)
    ref = _reference(x, w, b, gamma, beta)
    assert out.shape == x.shape
    assert jnp.allclose(out, ref, atol=1e-4, rtol=1e-4), "f32 mismatch vs reference"

    # bf16 fast path: bf16 matmul operands, f32 accumulation + f32 GELU/LN math.
    out_bf16 = mlp_forward(x.astype(jnp.bfloat16), w_t.astype(jnp.bfloat16), b, gamma, beta)
    out_bf16 = jax.block_until_ready(out_bf16)
    out_bf16_f32 = out_bf16.astype(jnp.float32)
    assert out_bf16.shape == x.shape
    assert bool(jnp.all(jnp.isfinite(out_bf16_f32)))
    assert jnp.allclose(out_bf16_f32, ref, atol=1e-1, rtol=1e-1), "bf16 mismatch vs reference"

    print("KERNEL_OK")
</pallas_src>

<mosaic_0001>
module attributes {stable_mosaic.version = 11 : i64} {
  func.func @_mlp_kernel(%arg0: i32, %arg1: memref<8x768xf32, #tpu.memory_space<vmem>>, %arg2: memref<768x768xf32, #tpu.memory_space<vmem>>, %arg3: memref<1x768xf32, #tpu.memory_space<vmem>>, %arg4: memref<1x768xf32, #tpu.memory_space<vmem>>, %arg5: memref<1x768xf32, #tpu.memory_space<vmem>>, %arg6: memref<8x768xf32, #tpu.memory_space<vmem>>) attributes {dimension_semantics = [#tpu.dimension_semantics<parallel>], iteration_bounds = array<i64: 2>, scalar_prefetch = 0 : i64, scratch_operands = 0 : i64, tpu.core_type = #tpu.core_type<tc>, window_params = [{transform_indices = @transform_0, window_bounds = array<i64: 8, 768>}, {pipeline_mode = #tpu.pipeline_mode<synchronous>, transform_indices = @transform_1, window_bounds = array<i64: 768, 768>}, {pipeline_mode = #tpu.pipeline_mode<synchronous>, transform_indices = @transform_2, window_bounds = array<i64: 1, 768>}, {pipeline_mode = #tpu.pipeline_mode<synchronous>, transform_indices = @transform_3, window_bounds = array<i64: 1, 768>}, {pipeline_mode = #tpu.pipeline_mode<synchronous>, transform_indices = @transform_4, window_bounds = array<i64: 1, 768>}, {transform_indices = @transform_5, window_bounds = array<i64: 8, 768>}]} {
    %c0 = arith.constant 0 : index
    %c0_0 = arith.constant 0 : index
    %0 = vector.load %arg1[%c0, %c0_0] : memref<8x768xf32, #tpu.memory_space<vmem>>, vector<8x768xf32>
    %c0_1 = arith.constant 0 : index
    %c0_2 = arith.constant 0 : index
    %1 = vector.load %arg2[%c0_1, %c0_2] : memref<768x768xf32, #tpu.memory_space<vmem>>, vector<768x768xf32>
    %cst = arith.constant dense<0.000000e+00> : vector<8x768xf32>
    %2 = tpu.matmul %0, %1, %cst {dimension_numbers = #tpu.dot_dimension_numbers<[1], [0], [0], [1], [0, 0, 1, 1], [], []>} : vector<8x768xf32>, vector<768x768xf32>, vector<8x768xf32> -> vector<8x768xf32>
    %c0_3 = arith.constant 0 : index
    %c0_4 = arith.constant 0 : index
    %3 = vector.load %arg3[%c0_3, %c0_4] : memref<1x768xf32, #tpu.memory_space<vmem>>, vector<1x768xf32>
    %4 = vector.broadcast %3 : vector<1x768xf32> to vector<8x768xf32>
    %5 = arith.addf %2, %4 : vector<8x768xf32>
    %cst_5 = arith.constant 5.000000e-01 : f32
    %6 = vector.broadcast %cst_5 : f32 to vector<8x768xf32>
    %7 = arith.mulf %6, %5 : vector<8x768xf32>
    %cst_6 = arith.constant 0.707106769 : f32
    %8 = vector.broadcast %cst_6 : f32 to vector<8x768xf32>
    %9 = arith.mulf %5, %8 : vector<8x768xf32>
    %10 = math.erf %9 : vector<8x768xf32>
    %cst_7 = arith.constant 1.000000e+00 : f32
    %11 = vector.broadcast %cst_7 : f32 to vector<8x768xf32>
    %12 = arith.addf %11, %10 : vector<8x768xf32>
    %13 = arith.mulf %7, %12 : vector<8x768xf32>
    %cst_8 = arith.constant dense<0.000000e+00> : vector<8xf32>
    %14 = vector.multi_reduction <add>, %13, %cst_8 [1] : vector<8x768xf32> to vector<8xf32>
    %15 = vector.shape_cast %14 : vector<8xf32> to vector<8x1xf32>
    %cst_9 = arith.constant 7.680000e+02 : f32
    %16 = vector.broadcast %cst_9 : f32 to vector<8x1xf32>
    %17 = arith.divf %15, %16 : vector<8x1xf32>
    %18 = vector.broadcast %17 : vector<8x1xf32> to vector<8x768xf32>
    %19 = arith.subf %13, %18 : vector<8x768xf32>
    %20 = arith.mulf %19, %19 : vector<8x768xf32>
    %cst_10 = arith.constant dense<0.000000e+00> : vector<8xf32>
    %21 = vector.multi_reduction <add>, %20, %cst_10 [1] : vector<8x768xf32> to vector<8xf32>
    %22 = vector.shape_cast %21 : vector<8xf32> to vector<8x1xf32>
    %cst_11 = arith.constant 7.680000e+02 : f32
    %23 = vector.broadcast %cst_11 : f32 to vector<8x1xf32>
    %24 = arith.divf %22, %23 : vector<8x1xf32>
    %cst_12 = arith.constant 9.99999996E-13 : f32
    %25 = vector.broadcast %cst_12 : f32 to vector<8x1xf32>
    %26 = arith.addf %24, %25 : vector<8x1xf32>
    %27 = math.rsqrt %26 : vector<8x1xf32>
    %28 = vector.broadcast %27 : vector<8x1xf32> to vector<8x768xf32>
    %29 = arith.mulf %19, %28 : vector<8x768xf32>
    %c0_13 = arith.constant 0 : index
    %c0_14 = arith.constant 0 : index
    %30 = vector.load %arg4[%c0_13, %c0_14] : memref<1x768xf32, #tpu.memory_space<vmem>>, vector<1x768xf32>
    %31 = vector.broadcast %30 : vector<1x768xf32> to vector<8x768xf32>
    %32 = arith.mulf %29, %31 : vector<8x768xf32>
    %c0_15 = arith.constant 0 : index
    %c0_16 = arith.constant 0 : index
    %33 = vector.load %arg5[%c0_15, %c0_16] : memref<1x768xf32, #tpu.memory_space<vmem>>, vector<1x768xf32>
    %34 = vector.broadcast %33 : vector<1x768xf32> to vector<8x768xf32>
    %35 = arith.addf %32, %34 : vector<8x768xf32>
    %c0_17 = arith.constant 0 : index
    %c0_18 = arith.constant 0 : index
    %36 = vector.load %arg6[%c0_17, %c0_18] : memref<8x768xf32, #tpu.memory_space<vmem>>, vector<8x768xf32>
    tpu.vector_store %arg6[%c0_17, %c0_18], %35 {strides = array<i32>} : memref<8x768xf32, #tpu.memory_space<vmem>>, vector<8x768xf32>,
    return
  }
  func.func @transform_0(%arg0: i32) -> (i32, i32) {
    %c0_i32 = arith.constant 0 : i32
    %c0_i32_0 = arith.constant 0 : i32
    return %arg0, %c0_i32 : i32, i32
  }
  func.func @transform_1(%arg0: i32) -> (i32, i32) {
    %c0_i32 = arith.constant 0 : i32
    %c0_i32_0 = arith.constant 0 : i32
    %c0_i32_1 = arith.constant 0 : i32
    return %c0_i32, %c0_i32_0 : i32, i32
  }
  func.func @transform_2(%arg0: i32) -> (i32, i32) {
    %c0_i32 = arith.constant 0 : i32
    %c0_i32_0 = arith.constant 0 : i32
    %c0_i32_1 = arith.constant 0 : i32
    return %c0_i32, %c0_i32_0 : i32, i32
  }
  func.func @transform_3(%arg0: i32) -> (i32, i32) {
    %c0_i32 = arith.constant 0 : i32
    %c0_i32_0 = arith.constant 0 : i32
    %c0_i32_1 = arith.constant 0 : i32
    return %c0_i32, %c0_i32_0 : i32, i32
  }
  func.func @transform_4(%arg0: i32) -> (i32, i32) {
    %c0_i32 = arith.constant 0 : i32
    %c0_i32_0 = arith.constant 0 : i32
    %c0_i32_1 = arith.constant 0 : i32
    return %c0_i32, %c0_i32_0 : i32, i32
  }
  func.func @transform_5(%arg0: i32) -> (i32, i32) {
    %c0_i32 = arith.constant 0 : i32
    %c0_i32_0 = arith.constant 0 : i32
    return %arg0, %c0_i32 : i32, i32
  }
}

</mosaic_0001>

<bundles_post_ra>
// kernel: tpu_custom_call.1
= control target key start
LH: loop header
LB: loop body
LE: loop exit
PB: predicated region body
PF: predicated region fallthrough
CT: control target
= control target key end

     0   :  { %10 = vsyncpa [#allocation3], 0  ;;  %s3148_s0 = inlined_call_operand.hbm [shape: f32[16,768], index: 0, kind: input, shape index: {}]   ;;  %s3149_s1 = inlined_call_operand.hbm [shape: f32[768,768], index: 1, kind: input, shape index: {}]   ;;  %s3150_s2 = inlined_call_operand.hbm [shape: f32[1,768], index: 2, kind: input, shape index: {}]   ;;  %s3151_s3 = inlined_call_operand.hbm [shape: f32[1,768], index: 3, kind: input, shape index: {}]   ;;  %s3152_s4 = inlined_call_operand.hbm [shape: f32[1,768], index: 4, kind: input, shape index: {}]   ;;  %s3153_s5 = inlined_call_operand.hbm [shape: f32[16,768], index: 5, kind: output, shape index: {}]  }
   0x1   :  { %12 = vsyncpa [#allocation3 + $0x1], 0 }
   0x2   :  { %13 = vsyncpa [#allocation6], 0 }
   0x3   :  { %14 = vsyncpa [#allocation9], 0 }
   0x4   :  { %15 = vsyncpa [#allocation4], 0 }
   0x5   :  { %17 = vsyncpa [#allocation4 + $0x1], 0  ;;  %s2796_s18 = smov 0   ;;  %s2798_s19 = smov 0  }
   0x6   :  { %s2800_s20 = smov 0   ;;  %s2802_s21 = smov 0  }
   0x7 LB: > { %s2758_s22 = smov [#allocation5]   ;;  %s2817_s24 = sadd.s32 4294967295, %s2756_s21   ;;  %s2756_s21 = sphi %s2802_s21, %s3176_s21   ;;  %s2752_s20 = sphi %s2800_s20, %s3175_s20   ;;  %s2748_s19 = sphi %s2798_s19, %s3174_s19   ;;  %s2744_s18 = sphi %s2796_s18, %s3173_s18  }
   0x8   : > { %s176_s23 = sshll.u32 %s2758_s22, 4  ;;  %p1819_p0 = scmp.ge.s32.totalorder %s2756_s21, 1  ;;  %s2822_s23 = int_to_ptr.vmem [resolvable:$true] %s176_s23 }
   0x9   : > { %p3154_p1 = scmp.eq.s32.totalorder %s2817_s24, 0  ;;  %p164_p2 = scmp.lt.s32.totalorder %s2756_s21, 3 }
   0xa   : > { %s2759_s26 = smov [#allocation8]   ;;  %s2760_s29 = smov [#allocation7]  }
   0xb   : > { %p2824_p3 = pnand %p1819_p0, %p164_p2  ;;  %s201_s27 = sshll.u32 %s2759_s26, 4  ;;  %s2837_s27 = int_to_ptr.vmem [resolvable:$true] %s201_s27 }
   0xc   : > { %s190_s30 = sshll.u32 %s2760_s29, 4  ;;  %s2540_s8 = scalar_lea.hbm %s3149_s1, 73728  ;;  %s2839_s30 = int_to_ptr.vmem [resolvable:$true] %s190_s30 }
   0xd   : > { %s3157_s25 = scalar_select %p2824_p3, 1, 0 }
   0xe   : > { %p2452_p5 = pneg %p2824_p3  ;;  %p2541_p7 = scmp.ne.s32.totalorder %s3149_s1, %s2540_s8 }
   0xf   : > { %p2547_p11 = scmp.lt.u32.totalorder %s2540_s8, %s3149_s1 }
  0x10   : > { %p2833_p6 = pnand %p2452_p5, %p3154_p1 }
  0x12   : > { %p2849_p8 = pneg %p2833_p6 }
  0x14   : > { %p2543_p9 = pnand %p2849_p8, %p2541_p7 }
  0x16   : > { %p2544_p10 = pneg %p2543_p9 }
  0x18   : > { %p2549_p12 = pnand %p2547_p11, %p2544_p10 }
  0x1a   : > { %2552 = shalt.err (!%p2549_p12)
}
  0x1b   : > { %s2553_s14 = scalar_lea.vmem %s2822_s23, 73728  ;;  %p2561_p5 = scmp.lt.s32.totalorder %s2822_s23, %s2822_s23 }
  0x1c   : > { %p2554_p13 = scmp.ne.s32.totalorder %s2822_s23, %s2553_s14  ;;  %p2562_p4 = scmp.lt.s32.totalorder %s2553_s14, %s2553_s14 }
  0x1e   : > { %p2556_p0 = pnand %p2554_p13, %p2849_p8  ;;  %p2563_p7 = por %p2562_p4, %p2561_p5 }
  0x20   : > { %p2557_p2 = pneg %p2556_p0 }
  0x22   : > { %p2564_p9 = pnand %p2563_p7, %p2557_p2 }
  0x24   : > { %2567 = shalt.err (!%p2564_p9)
}
  0x25   : > { %s2761_s15 = smov 768   ;;  %s2762_s16 = smov 48  }
  0x26   : > { %2455 = dma.hbm_to_vmem [thread:$0]  (!%p2833_p6), %s3149_s1, 73728, %s2822_s23, [#allocation6], %s2761_s15, %s2761_s15, %s2762_s16  }
  0x27   : > { %s2568_s6 = scalar_lea.hbm %s3151_s3, 96 }
  0x28   : > { %p2569_p4 = scmp.ne.s32.totalorder %s3151_s3, %s2568_s6  ;;  %p2575_p12 = scmp.lt.u32.totalorder %s2568_s6, %s3151_s3 }
  0x2a   : > { %p2571_p10 = pnand %p2569_p4, %p2849_p8 }
  0x2c   : > { %p2572_p11 = pneg %p2571_p10 }
  0x2e   : > { %p2577_p13 = pnand %p2575_p12, %p2572_p11 }
  0x30   : > { %2580 = shalt.err (!%p2577_p13)
}
  0x31   : > { %s2581_s23 = scalar_lea.vmem %s2837_s27, 96  ;;  %p2589_p7 = scmp.lt.s32.totalorder %s2837_s27, %s2837_s27 }
  0x32   : > { %p2582_p0 = scmp.ne.s32.totalorder %s2837_s27, %s2581_s23  ;;  %p2590_p9 = scmp.lt.s32.totalorder %s2581_s23, %s2581_s23 }
  0x34   : > { %p2584_p2 = pnand %p2582_p0, %p2849_p8  ;;  %p2591_p4 = por %p2590_p9, %p2589_p7 }
  0x36   : > { %p2585_p5 = pneg %p2584_p2 }
  0x38   : > { %p2592_p10 = pnand %p2591_p4, %p2585_p5 }
  0x3a   : > { %2595 = shalt.err (!%p2592_p10)
}
  0x3b   : > { %2461 = dma.hbm_to_vmem [thread:$0]  (!%p2833_p6), %s3151_s3, 96, %s2837_s27, [#allocation9]  }
  0x3c   : > { %s2596_s16 = scalar_lea.hbm %s3150_s2, 96 }
  0x3d   : > { %p2597_p11 = scmp.ne.s32.totalorder %s3150_s2, %s2596_s16  ;;  %p2603_p0 = scmp.lt.u32.totalorder %s2596_s16, %s3150_s2 }
  0x3f   : > { %p2599_p12 = pnand %p2597_p11, %p2849_p8 }
  0x41   : > { %p2600_p13 = pneg %p2599_p12 }
  0x43   : > { %p2605_p2 = pnand %p2603_p0, %p2600_p13 }
  0x45   : > { %2608 = shalt.err (!%p2605_p2)
}
  0x46   : > { %s2609_s27 = scalar_lea.vmem %s2839_s30, 96  ;;  %p2617_p4 = scmp.lt.s32.totalorder %s2839_s30, %s2839_s30 }
  0x47   : > { %p2610_p5 = scmp.ne.s32.totalorder %s2839_s30, %s2609_s27  ;;  %p2618_p10 = scmp.lt.s32.totalorder %s2609_s27, %s2609_s27 }
  0x49   : > { %p2612_p7 = pnand %p2610_p5, %p2849_p8  ;;  %p2619_p11 = por %p2618_p10, %p2617_p4 }
  0x4b   : > { %p2613_p9 = pneg %p2612_p7 }
  0x4d   : > { %p2620_p12 = pnand %p2619_p11, %p2613_p9 }
  0x4f   : > { %2623 = shalt.err (!%p2620_p12)
}
  0x50   : > { %2458 = dma.hbm_to_vmem [thread:$0]  (!%p2833_p6), %s3150_s2, 96, %s2839_s30, [#allocation6]  }
  0x51   : > { %s2763_s8 = smov [#allocation10]   ;;  %s2624_s12 = scalar_lea.hbm %s3152_s4, 96 }
  0x52   : > { %s212_s9 = sshll.u32 %s2763_s8, 4  ;;  %p2625_p13 = scmp.ne.s32.totalorder %s3152_s4, %s2624_s12  ;;  %s213_s9 = int_to_ptr.vmem [resolvable:$true] %s212_s9 }
  0x53   : > { %p2631_p5 = scmp.lt.u32.totalorder %s2624_s12, %s3152_s4 }
  0x54   : > { %p2627_p0 = pnand %p2625_p13, %p2849_p8 }
  0x56   : > { %p2628_p2 = pneg %p2627_p0 }
  0x58   : > { %p2633_p7 = pnand %p2631_p5, %p2628_p2 }
  0x5a   : > { %2636 = shalt.err (!%p2633_p7)
}
  0x5b   : > { %s2637_s30 = scalar_lea.vmem %s213_s9, 96  ;;  %p2645_p11 = scmp.lt.s32.totalorder %s213_s9, %s213_s9 }
  0x5c   : > { %p2638_p9 = scmp.ne.s32.totalorder %s213_s9, %s2637_s30  ;;  %p2646_p12 = scmp.lt.s32.totalorder %s2637_s30, %s2637_s30 }
  0x5e   : > { %p2640_p4 = pnand %p2638_p9, %p2849_p8  ;;  %p2647_p1 = por %p2646_p12, %p2645_p11 }
  0x60   : > { %p2641_p10 = pneg %p2640_p4 }
  0x62   : > { %p2648_p3 = pnand %p2647_p1, %p2641_p10 }
  0x64   : > { %2651 = shalt.err (!%p2648_p3)
}
  0x65   : > { %2464 = dma.hbm_to_vmem [thread:$0]  (!%p2833_p6), %s3152_s4, 96, %s213_s9, [#allocation9]  }
  0x66   : > { %s1818_s11 = sadd.s32 4294967294, %s2756_s21   ;;  %s2936_s28 = sadd.s32 1, %s2756_s21  }
  0x67   : > { %s27_s26 = ssub.s32 %s2756_s21, %s2936_s28  ;;  %s30_s29 = sadd.s32 1, %s2752_s20 }
  0x68   : > { %p28_p1 = scmp.eq.s32.totalorder %s27_s26, 0  ;;  %p37_p3 = scmp.ne.s32.totalorder %s2752_s20, %s2748_s19 }
  0x69   : > { %p38_p8 = scmp.eq.s32.totalorder %s2756_s21, 0  ;;  %p43_p13 = scmp.ne.s32.totalorder %s2748_s19, %s2744_s18 }
  0x6a   : > { %s2947_s27 = scalar_select %p28_p1, %s2752_s20, %s30_s29  }
  0x6b   : > { %p39_p0 = por %p38_p8, %p37_p3  ;;  %p3160_p2 = scmp.eq.s32.totalorder %s2817_s24, 0 }
  0x6c   : > { %p151_p6 = scmp.eq.s32.totalorder %s2817_s24, 1  ;;  %p157_p7 = scmp.eq.s32.totalorder %s1818_s11, 1 }
  0x6d   : > { %p2951_p5 = por %p3160_p2, %p43_p13  ;;  %p2477_p9 = scmp.lt.s32.totalorder %s2756_s21, 2 }
  0x6e   : > { %s223_s7 = sand.u32 1, %s2752_s20   ;;  %p2958_p4 = por %p151_p6, %p37_p3 }
  0x6f   : > { %p2962_p10 = por %p157_p7, %p43_p13  ;;  %s2428_s10 = smul.u32 48, %s223_s7 }
  0x70   : > { %s3162_s8 = scalar_select %p2958_p4, 1, 0 }
  0x71   : > { %s3163_s9 = scalar_select %p2962_p10, 1, 0 }
  0x72   : > { %s2429_s23 = smul.u32 768, %s2756_s21  ;;  %p2967_p11 = pnand %p2477_p9, %p39_p0 }
  0x73   : > { %s227_s16 = scalar_lea.vmem [#allocation2], %s2428_s10  ;;  %s224_s17 = scalar_lea.sflag [#allocation3], %s223_s7 }
  0x74   : > { %s2974_s15 = scalar_lea.hbm %s3148_s0, %s2429_s23  ;;  %s235_s30 = sshll.u32 %s227_s16, 4  ;;  %s2976_s30 = int_to_ptr.vmem [resolvable:$true] %s235_s30 }
  0x75   : > { %s2652_s22 = scalar_lea.hbm %s2974_s15, 768  ;;  %p2654_p1 = pneg %p2967_p11 }
  0x76   : > { %p2653_p12 = scmp.ne.s32.totalorder %s2974_s15, %s2652_s22  ;;  %s2657_s29 = scalar_lea.hbm %s3148_s0, 1536 }
  0x77   : > { %p2658_p13 = scmp.lt.u32.totalorder %s2974_s15, %s3148_s0  ;;  %p2659_p0 = scmp.lt.u32.totalorder %s2657_s29, %s2652_s22 }
  0x78   : > { %p2655_p3 = pnand %p2654_p1, %p2653_p12  ;;  %p2661_p6 = scmp.lt.u32.totalorder %s2652_s22, %s2974_s15 }
  0x79   : > { %p2660_p2 = por %p2659_p0, %p2658_p13 }
  0x7a   : > { %p2656_p8 = pneg %p2655_p3 }
  0x7b   : > { %p2662_p7 = por %p2661_p6, %p2660_p2 }
  0x7d   : > { %p2663_p9 = pnand %p2662_p7, %p2656_p8 }
  0x7f   : > { %2666 = shalt.err (!%p2663_p9)
}
  0x80   : > { %s2667_s7 = scalar_lea.vmem %s2976_s30, 768  ;;  %s2764_s10 = smov [#allocation2]  }
  0x81   : > { %p2668_p12 = scmp.ne.s32.totalorder %s2976_s30, %s2667_s7  ;;  %s2672_s14 = sshll.u32 %s2764_s10, 4  ;;  %s2673_s14 = int_to_ptr.vmem [resolvable:$false] %s2672_s14 }
  0x82   : > { %s2674_s16 = scalar_lea.vmem %s2673_s14, 1536  ;;  %p2675_p4 = scmp.lt.s32.totalorder %s2976_s30, %s2673_s14 }
  0x83   : > { %p2670_p3 = pnand %p2668_p12, %p2654_p1  ;;  %p2676_p13 = scmp.lt.s32.totalorder %s2674_s16, %s2667_s7 }
  0x85   : > { %p2671_p10 = pneg %p2670_p3  ;;  %p2677_p0 = por %p2676_p13, %p2675_p4 }
  0x87   : > { %p2678_p2 = pnand %p2677_p0, %p2671_p10 }
  0x89   : > { %2681 = shalt.err (!%p2678_p2)
}
  0x8a   : > { %2468 = dma.hbm_to_vmem [thread:$0]  (!%p2967_p11), %s2974_s15, 768, %s2976_s30, %s224_s17  }
  0x8b   : > { %p3165_p8 = scmp.ne.s32.totalorder %s3157_s25, 0 }
  0x8c   : > { %s3006_s22 = sand.u32 (!%p3165_p8), 1, %s2748_s19  }
  0x8d   : > { %244 = sbr.rel (%p3165_p8) target bundleno = 1052 (0x41c), region = 40  ;;  %s247_s26 = scalar_lea.sflag (!%p3165_p8), [#allocation3], %s3006_s22 }
  0x8e   : > { %s2430_s11 = smul.u32 (!%p3165_p8), 48, %s3006_s22 }
  0x90   : > { %s3012_s29 = scalar_lea.vmem (!%p3165_p8), [#allocation2], %s2430_s11 }
  0x94   : > { %2727 = dma.done.wait (%p2951_p5), %s247_s26, 768  }
  0x95   : > { %2729 = vsyncadd (%p2951_p5), %s247_s26, 4294966528  ;;  %p3166_p4 = scmp.eq.s32.totalorder %s2817_s24, 0 }
  0x97   : > { %2731 = dma.done.wait (%p3166_p4), [#allocation6], 73824   ;;  %p3167_p10 = pmov %p3166_p4 }
  0x98   : > { %p3168_p11 = pmov %p3166_p4 }
  0x99   : > { %2733 = vsyncadd (%p3167_p10), [#allocation6], 4294893472 }
  0x9a   : > { %2735 = dma.done.wait (%p3168_p11), [#allocation9], 192   ;;  %p3169_p1 = pmov %p3166_p4 }
  0x9b   : > { %v300_v0 = vld [vmem:[#allocation5 + $0x8] sm:$0xff]  ;;  %v306_v1 = vld [vmem:[#allocation5 + $0x38] sm:$0xff]  ;;  %v299_v5 = vld [vmem:[#allocation5] sm:$0xff]  ;;  %s2431_s25 = smul.u32 768, %s2817_s24  ;;  %s292_s6 = scalar_lea.vmem [#allocation11], %s2430_s11 }
  0x9c   : > { %2737 = vsyncadd (%p3169_p1), [#allocation9], 4294967104  ;;  %v492_v2 = vld [vmem:[#allocation5 + $0x608] sm:$0xff]  ;;  %v1834_v3 = vpack.c.bf16 %v306_v1, %v300_v0  ;;  %v498_v4 = vld [vmem:[#allocation5 + $0x638] sm:$0xff]  ;;  %s1710_s12 = sshll.u32 %s292_s6, 4  ;;  %s1696_s17 = scalar_lea.sflag [#allocation4], %s3006_s22  ;;  %s3106_s12 = int_to_ptr.vmem [resolvable:$true] %s1710_s12 }
  0x9d   : > { %v305_v6 = vld [vmem:[#allocation5 + $0x30] sm:$0xff]  ;;  %v1898_v7 = vpack.c.bf16 %v498_v4, %v492_v2  ;;  %v491_v9 = vld [vmem:[#allocation5 + $0x600] sm:$0xff]  ;;  %v312_v11 = vld [vmem:[#allocation5 + $0x68] sm:$0xff]  ;;  %s3104_s24 = scalar_lea.hbm %s3153_s5, %s2431_s25  ;;  %s2682_s23 = scalar_lea.vmem %s3106_s12, 768 }
  0x9e   : > { %v1836_v8 = vpack.c.bf16 %v305_v6, %v299_v5  ;;  %v497_v10 = vld [vmem:[#allocation5 + $0x630] sm:$0xff]  ;;  %1835 = vmatprep.subr.bf16.mxu1 %v1834_v3  ;;  %v318_v13 = vld [vmem:[#allocation5 + $0x98] sm:$0xff]  ;;  %v504_v14 = vld [vmem:[#allocation5 + $0x668] sm:$0xff]  ;;  %p2683_p5 = scmp.ne.s32.totalorder %s3106_s12, %s2682_s23  ;;  %p3170_p6 = scmp.ne.s32.totalorder %s3162_s8, 0 }
  0x9f   : > { %v1900_v12 = vpack.c.bf16 %v497_v10, %v491_v9  ;;  %v510_v15 = vld [vmem:[#allocation5 + $0x698] sm:$0xff]  ;;  %1899 = vmatprep.subr.bf16.mxu0 %v1898_v7  ;;  %v1838_v16 = vpack.c.bf16 %v318_v13, %v312_v11  ;;  %v311_v18 = vld [vmem:[#allocation5 + $0x60] sm:$0xff]  ;;  %v317_v19 = vld [vmem:[#allocation5 + $0x90] sm:$0xff]  ;;  %s2765_s13 = smov [#allocation11]  }
  0xa0   : > { %1837 = vmatpush1.bf16.msra.mxu1 %v1836_v8  ;;  %v1902_v17 = vpack.c.bf16 %v510_v15, %v504_v14  ;;  %v503_v20 = vld [vmem:[#allocation5 + $0x660] sm:$0xff]  ;;  %v1840_v21 = vpack.c.bf16 %v317_v19, %v311_v18  ;;  %v509_v22 = vld [vmem:[#allocation5 + $0x690] sm:$0xff]  ;;  %v324_v23 = vld [vmem:[#allocation5 + $0xc8] sm:$0xff]  ;;  %p2684_p7 = pnand %p2683_p5, %p3170_p6  ;;  %s2686_s7 = sshll.u32 %s2765_s13, 4  ;;  %s2687_s7 = int_to_ptr.vmem [resolvable:$false] %s2686_s7 }
  0xa1   : > { %1901 = vmatpush1.bf16.msra.mxu0 %v1900_v12  ;;  %v330_v24 = vld [vmem:[#allocation5 + $0xf8] sm:$0xff]  ;;  %1839 = vmatprep.subr.bf16.mxu1 %v1838_v16  ;;  %v1904_v25 = vpack.c.bf16 %v509_v22, %v503_v20  ;;  %v516_v27 = vld [vmem:[#allocation5 + $0x6c8] sm:$0xff]  ;;  %v323_v29 = vld [vmem:[#allocation5 + $0xc0] sm:$0xff]  ;;  %s2688_s10 = scalar_lea.vmem %s2687_s7, 1536  ;;  %p2689_p12 = scmp.lt.s32.totalorder %s3106_s12, %s2687_s7 }
  0xa2   : > { %1903 = vmatprep.subr.bf16.mxu0 %v1902_v17  ;;  %v1842_v26 = vpack.c.bf16 %v330_v24, %v324_v23  ;;  %v522_v28 = vld [vmem:[#allocation5 + $0x6f8] sm:$0xff]  ;;  %v329_v31 = vld [vmem:[#allocation5 + $0xf0] sm:$0xff]  ;;  %v515_v32 = vld [vmem:[#allocation5 + $0x6c0] sm:$0xff]  ;;  %p2685_p9 = pneg %p2684_p7  ;;  %p2690_p3 = scmp.lt.s32.totalorder %s2688_s10, %s2682_s23 }
  0xa3   : > { %v1906_v30 = vpack.c.bf16 %v522_v28, %v516_v27  ;;  %v521_v33 = vld [vmem:[#allocation5 + $0x6f0] sm:$0xff]  ;;  %v1844_v34 = vpack.c.bf16 %v329_v31, %v323_v29  ;;  %v336_v35 = vld [vmem:[#allocation5 + $0x128] sm:$0xff]  ;;  %v342_v36 = vld [vmem:[#allocation5 + $0x158] sm:$0xff] }
  0xa4   : > { %1841 = vmatpush1.bf16.msra.mxu1 %v1840_v21  ;;  %v528_v37 = vld [vmem:[#allocation5 + $0x728] sm:$0xff]  ;;  %v1908_v38 = vpack.c.bf16 %v521_v33, %v515_v32  ;;  %v1846_v39 = vpack.c.bf16 %v342_v36, %v336_v35  ;;  %v534_v40 = vld [vmem:[#allocation5 + $0x758] sm:$0xff]  ;;  %v335_v41 = vld [vmem:[#allocation5 + $0x120] sm:$0xff]  ;;  %p2691_p13 = por %p2690_p3, %p2689_p12 }
  0xa5   : > { %1905 = vmatpush1.bf16.msra.mxu0 %v1904_v25  ;;  %1843 = vmatprep.subr.bf16.mxu1 %v1842_v26  ;;  %v341_v42 = vld [vmem:[#allocation5 + $0x150] sm:$0xff]  ;;  %v1910_v43 = vpack.c.bf16 %v534_v40, %v528_v37  ;;  %v527_v44 = vld [vmem:[#allocation5 + $0x720] sm:$0xff]  ;;  %v348_v46 = vld [vmem:[#allocation5 + $0x188] sm:$0xff] }
  0xa6   : > { %1907 = vmatprep.subr.bf16.mxu0 %v1906_v30  ;;  %v533_v45 = vld [vmem:[#allocation5 + $0x750] sm:$0xff]  ;;  %v354_v47 = vld [vmem:[#allocation5 + $0x1b8] sm:$0xff]  ;;  %v540_v48 = vld [vmem:[#allocation5 + $0x788] sm:$0xff]  ;;  %v1848_v50 = vpack.c.bf16 %v341_v42, %v335_v41  ;;  %p2692_p0 = pnand %p2691_p13, %p2685_p9 }
  0xa7   : > { %v546_v49 = vld [vmem:[#allocation5 + $0x7b8] sm:$0xff]  ;;  %v1912_v51 = vpack.c.bf16 %v533_v45, %v527_v44  ;;  %v1850_v52 = vpack.c.bf16 %v354_v47, %v348_v46  ;;  %v347_v53 = vld [vmem:[#allocation5 + $0x180] sm:$0xff]  ;;  %v353_v54 = vld [vmem:[#allocation5 + $0x1b0] sm:$0xff] }
  0xa8   : > { %1845 = vmatpush1.bf16.msra.mxu1 %v1844_v34  ;;  %v539_v55 = vld [vmem:[#allocation5 + $0x780] sm:$0xff]  ;;  %v1914_v56 = vpack.c.bf16 %v546_v49, %v540_v48  ;;  %v545_v57 = vld [vmem:[#allocation5 + $0x7b0] sm:$0xff]  ;;  %v360_v58 = vld [vmem:[#allocation5 + $0x1e8] sm:$0xff]  ;;  %v1852_v62 = vpack.c.bf16 %v353_v54, %v347_v53 }
  0xa9   : > { %1909 = vmatpush1.bf16.msra.mxu0 %v1908_v38  ;;  %1847 = vmatprep.subr.bf16.mxu1 %v1846_v39  ;;  %v366_v59 = vld [vmem:[#allocation5 + $0x218] sm:$0xff]  ;;  %v552_v60 = vld [vmem:[#allocation5 + $0x7e8] sm:$0xff]  ;;  %v1916_v63 = vpack.c.bf16 %v545_v57, %v539_v55  ;;  %v359_v1 = vld [vmem:[#allocation5 + $0x1e0] sm:$0xff] }
  0xaa   : > { %1911 = vmatprep.subr.bf16.mxu0 %v1910_v43  ;;  %v558_v61 = vld [vmem:[#allocation5 + $0x818] sm:$0xff]  ;;  %v1854_v0 = vpack.c.bf16 %v366_v59, %v360_v58  ;;  %v365_v2 = vld [vmem:[#allocation5 + $0x210] sm:$0xff]  ;;  %v551_v3 = vld [vmem:[#allocation5 + $0x7e0] sm:$0xff] }
  0xab   : > { %v1918_v4 = vpack.c.bf16 %v558_v61, %v552_v60  ;;  %v557_v5 = vld [vmem:[#allocation5 + $0x810] sm:$0xff]  ;;  %v372_v6 = vld [vmem:[#allocation5 + $0x248] sm:$0xff]  ;;  %v378_v7 = vld [vmem:[#allocation5 + $0x278] sm:$0xff]  ;;  %v1856_v10 = vpack.c.bf16 %v365_v2, %v359_v1 }
  0xac   : > { %1849 = vmatpush1.bf16.msra.mxu1 %v1848_v50  ;;  %v564_v8 = vld [vmem:[#allocation5 + $0x848] sm:$0xff]  ;;  %v570_v9 = vld [vmem:[#allocation5 + $0x878] sm:$0xff]  ;;  %v1920_v11 = vpack.c.bf16 %v557_v5, %v551_v3  ;;  %v1858_v12 = vpack.c.bf16 %v378_v7, %v372_v6  ;;  %v371_v13 = vld [vmem:[#allocation5 + $0x240] sm:$0xff] }
  0xad   : > { %1913 = vmatpush1.bf16.msra.mxu0 %v1912_v51  ;;  %1851 = vmatprep.subr.bf16.mxu1 %v1850_v52  ;;  %v377_v14 = vld [vmem:[#allocation5 + $0x270] sm:$0xff]  ;;  %v563_v15 = vld [vmem:[#allocation5 + $0x840] sm:$0xff]  ;;  %v1922_v16 = vpack.c.bf16 %v570_v9, %v564_v8  ;;  %v384_v18 = vld [vmem:[#allocation5 + $0x2a8] sm:$0xff] }
  0xae   : > { %1915 = vmatprep.subr.bf16.mxu0 %v1914_v56  ;;  %v569_v17 = vld [vmem:[#allocation5 + $0x870] sm:$0xff]  ;;  %v390_v19 = vld [vmem:[#allocation5 + $0x2d8] sm:$0xff]  ;;  %v576_v20 = vld [vmem:[#allocation5 + $0x8a8] sm:$0xff]  ;;  %v1860_v22 = vpack.c.bf16 %v377_v14, %v371_v13 }
  0xaf   : > { %v582_v21 = vld [vmem:[#allocation5 + $0x8d8] sm:$0xff]  ;;  %v1924_v23 = vpack.c.bf16 %v569_v17, %v563_v15  ;;  %v1862_v24 = vpack.c.bf16 %v390_v19, %v384_v18  ;;  %v383_v25 = vld [vmem:[#allocation5 + $0x2a0] sm:$0xff]  ;;  %v389_v26 = vld [vmem:[#allocation5 + $0x2d0] sm:$0xff] }
  0xb0   : > { %1853 = vmatpush1.bf16.msra.mxu1 %v1852_v62  ;;  %v575_v27 = vld [vmem:[#allocation5 + $0x8a0] sm:$0xff]  ;;  %v1926_v28 = vpack.c.bf16 %v582_v21, %v576_v20  ;;  %v581_v29 = vld [vmem:[#allocation5 + $0x8d0] sm:$0xff]  ;;  %v396_v30 = vld [vmem:[#allocation5 + $0x308] sm:$0xff]  ;;  %v1864_v34 = vpack.c.bf16 %v389_v26, %v383_v25 }
  0xb1   : > { %1917 = vmatpush1.bf16.msra.mxu0 %v1916_v63  ;;  %1855 = vmatprep.subr.bf16.mxu1 %v1854_v0  ;;  %v402_v31 = vld [vmem:[#allocation5 + $0x338] sm:$0xff]  ;;  %v588_v32 = vld [vmem:[#allocation5 + $0x908] sm:$0xff]  ;;  %v1928_v35 = vpack.c.bf16 %v581_v29, %v575_v27  ;;  %v395_v37 = vld [vmem:[#allocation5 + $0x300] sm:$0xff] }
  0xb2   : > { %1919 = vmatprep.subr.bf16.mxu0 %v1918_v4  ;;  %v594_v33 = vld [vmem:[#allocation5 + $0x938] sm:$0xff]  ;;  %v1866_v36 = vpack.c.bf16 %v402_v31, %v396_v30  ;;  %v401_v38 = vld [vmem:[#allocation5 + $0x330] sm:$0xff]  ;;  %v587_v39 = vld [vmem:[#allocation5 + $0x900] sm:$0xff] }
  0xb3   : > { %v1930_v40 = vpack.c.bf16 %v594_v33, %v588_v32  ;;  %v593_v41 = vld [vmem:[#allocation5 + $0x930] sm:$0xff]  ;;  %v408_v42 = vld [vmem:[#allocation5 + $0x368] sm:$0xff]  ;;  %v414_v43 = vld [vmem:[#allocation5 + $0x398] sm:$0xff]  ;;  %v1868_v46 = vpack.c.bf16 %v401_v38, %v395_v37 }
  0xb4   : > { %1857 = vmatpush1.bf16.msra.mxu1 %v1856_v10  ;;  %v600_v44 = vld [vmem:[#allocation5 + $0x968] sm:$0xff]  ;;  %v606_v45 = vld [vmem:[#allocation5 + $0x998] sm:$0xff]  ;;  %v1932_v47 = vpack.c.bf16 %v593_v41, %v587_v39  ;;  %v1870_v48 = vpack.c.bf16 %v414_v43, %v408_v42  ;;  %v407_v49 = vld [vmem:[#allocation5 + $0x360] sm:$0xff] }
  0xb5   : > { %1921 = vmatpush1.bf16.msra.mxu0 %v1920_v11  ;;  %1859 = vmatprep.subr.bf16.mxu1 %v1858_v12  ;;  %v413_v50 = vld [vmem:[#allocation5 + $0x390] sm:$0xff]  ;;  %v599_v51 = vld [vmem:[#allocation5 + $0x960] sm:$0xff]  ;;  %v1934_v52 = vpack.c.bf16 %v606_v45, %v600_v44  ;;  %v420_v54 = vld [vmem:[#allocation5 + $0x3c8] sm:$0xff] }
  0xb6   : > { %1923 = vmatprep.subr.bf16.mxu0 %v1922_v16  ;;  %v605_v53 = vld [vmem:[#allocation5 + $0x990] sm:$0xff]  ;;  %v426_v55 = vld [vmem:[#allocation5 + $0x3f8] sm:$0xff]  ;;  %v612_v56 = vld [vmem:[#allocation5 + $0x9c8] sm:$0xff]  ;;  %v1872_v58 = vpack.c.bf16 %v413_v50, %v407_v49 }
  0xb7   : > { %v618_v57 = vld [vmem:[#allocation5 + $0x9f8] sm:$0xff]  ;;  %v1936_v59 = vpack.c.bf16 %v605_v53, %v599_v51  ;;  %v1874_v60 = vpack.c.bf16 %v426_v55, %v420_v54  ;;  %v419_v61 = vld [vmem:[#allocation5 + $0x3c0] sm:$0xff]  ;;  %v425_v62 = vld [vmem:[#allocation5 + $0x3f0] sm:$0xff] }
  0xb8   : > { %1861 = vmatpush1.bf16.msra.mxu1 %v1860_v22  ;;  %v611_v63 = vld [vmem:[#allocation5 + $0x9c0] sm:$0xff]  ;;  %v1938_v0 = vpack.c.bf16 %v618_v57, %v612_v56  ;;  %v617_v1 = vld [vmem:[#allocation5 + $0x9f0] sm:$0xff]  ;;  %v432_v2 = vld [vmem:[#allocation5 + $0x428] sm:$0xff]  ;;  %v1876_v6 = vpack.c.bf16 %v425_v62, %v419_v61 }
  0xb9   : > { %1925 = vmatpush1.bf16.msra.mxu0 %v1924_v23  ;;  %1863 = vmatprep.subr.bf16.mxu1 %v1862_v24  ;;  %v438_v3 = vld [vmem:[#allocation5 + $0x458] sm:$0xff]  ;;  %v624_v4 = vld [vmem:[#allocation5 + $0xa28] sm:$0xff]  ;;  %v431_v7 = vld [vmem:[#allocation5 + $0x420] sm:$0xff]  ;;  %v1940_v8 = vpack.c.bf16 %v617_v1, %v611_v63 }
  0xba   : > { %1927 = vmatprep.subr.bf16.mxu0 %v1926_v28  ;;  %v630_v5 = vld [vmem:[#allocation5 + $0xa58] sm:$0xff]  ;;  %v1878_v9 = vpack.c.bf16 %v438_v3, %v432_v2  ;;  %v437_v10 = vld [vmem:[#allocation5 + $0x450] sm:$0xff]  ;;  %v623_v11 = vld [vmem:[#allocation5 + $0xa20] sm:$0xff] }
  0xbb   : > { %v629_v12 = vld [vmem:[#allocation5 + $0xa50] sm:$0xff]  ;;  %v1942_v13 = vpack.c.bf16 %v630_v5, %v624_v4  ;;  %v444_v14 = vld [vmem:[#allocation5 + $0x488] sm:$0xff]  ;;  %v450_v15 = vld [vmem:[#allocation5 + $0x4b8] sm:$0xff]  ;;  %v1880_v20 = vpack.c.bf16 %v437_v10, %v431_v7 }
  0xbc   : > { %1865 = vmatpush1.bf16.msra.mxu1 %v1864_v34  ;;  %v3027_v16 = vld [vmem:[%s3012_s29 + $0x8] sm:$0xff]  ;;  %v3031_v19 = vld [vmem:[%s3012_s29 + $0x18] sm:$0xff]  ;;  %v1944_v21 = vpack.c.bf16 %v629_v12, %v623_v11  ;;  %v1882_v22 = vpack.c.bf16 %v450_v15, %v444_v14  ;;  %v443_v23 = vld [vmem:[#allocation5 + $0x480] sm:$0xff] }
  0xbd   : > { %1929 = vmatpush1.bf16.msra.mxu0 %v1928_v35  ;;  %1867 = vmatprep.subr.bf16.mxu1 %v1866_v36  ;;  %v636_v17 = vld [vmem:[#allocation5 + $0xa88] sm:$0xff]  ;;  %v642_v18 = vld [vmem:[#allocation5 + $0xab8] sm:$0xff]  ;;  %v449_v24 = vld [vmem:[#allocation5 + $0x4b0] sm:$0xff] }
  0xbe   : > { %1931 = vmatprep.subr.bf16.mxu0 %v1930_v40  ;;  %971 = vmatprep.mubr.f32.mxu1 %v3027_v16  ;;  %v635_v25 = vld [vmem:[#allocation5 + $0xa80] sm:$0xff]  ;;  %v1946_v26 = vpack.c.bf16 %v642_v18, %v636_v17  ;;  %v641_v27 = vld [vmem:[#allocation5 + $0xab0] sm:$0xff]  ;;  %v456_v28 = vld [vmem:[#allocation5 + $0x4e8] sm:$0xff]  ;;  %v1884_v32 = vpack.c.bf16 %v449_v24, %v443_v23 }
  0xbf   : > { %1042 = vmatprep.mubr.f32.mxu0 %v3031_v19  ;;  %v462_v29 = vld [vmem:[#allocation5 + $0x518] sm:$0xff]  ;;  %v648_v30 = vld [vmem:[#allocation5 + $0xae8] sm:$0xff]  ;;  %v1948_v33 = vpack.c.bf16 %v641_v27, %v635_v25  ;;  %v455_v35 = vld [vmem:[#allocation5 + $0x4e0] sm:$0xff] }
  0xc0   : > { %1869 = vmatpush1.bf16.msra.mxu1 %v1868_v46  ;;  %v654_v31 = vld [vmem:[#allocation5 + $0xb18] sm:$0xff]  ;;  %v1886_v34 = vpack.c.bf16 %v462_v29, %v456_v28  ;;  %v461_v36 = vld [vmem:[#allocation5 + $0x510] sm:$0xff]  ;;  %v647_v37 = vld [vmem:[#allocation5 + $0xae0] sm:$0xff] }
  0xc1   : > { %1933 = vmatpush1.bf16.msra.mxu0 %v1932_v47  ;;  %1871 = vmatprep.subr.bf16.mxu1 %v1870_v48  ;;  %v1950_v38 = vpack.c.bf16 %v654_v31, %v648_v30  ;;  %v653_v39 = vld [vmem:[#allocation5 + $0xb10] sm:$0xff]  ;;  %v468_v40 = vld [vmem:[#allocation5 + $0x548] sm:$0xff]  ;;  %v474_v41 = vld [vmem:[#allocation5 + $0x578] sm:$0xff]  ;;  %v1888_v44 = vpack.c.bf16 %v461_v36, %v455_v35 }
  0xc2   : > { %1935 = vmatprep.subr.bf16.mxu0 %v1934_v52  ;;  %v660_v42 = vld [vmem:[#allocation5 + $0xb48] sm:$0xff]  ;;  %v666_v43 = vld [vmem:[#allocation5 + $0xb78] sm:$0xff]  ;;  %v1952_v45 = vpack.c.bf16 %v653_v39, %v647_v37  ;;  %v1890_v46 = vpack.c.bf16 %v474_v41, %v468_v40  ;;  %v467_v47 = vld [vmem:[#allocation5 + $0x540] sm:$0xff] }
  0xc3   : > { %v473_v48 = vld [vmem:[#allocation5 + $0x570] sm:$0xff]  ;;  %v659_v49 = vld [vmem:[#allocation5 + $0xb40] sm:$0xff]  ;;  %v1954_v50 = vpack.c.bf16 %v666_v43, %v660_v42  ;;  %v480_v52 = vld [vmem:[#allocation5 + $0x5a8] sm:$0xff] }
  0xc4   : > { %1873 = vmatpush1.bf16.msra.mxu1 %v1872_v58  ;;  %v665_v51 = vld [vmem:[#allocation5 + $0xb70] sm:$0xff]  ;;  %v486_v53 = vld [vmem:[#allocation5 + $0x5d8] sm:$0xff]  ;;  %v672_v54 = vld [vmem:[#allocation5 + $0xba8] sm:$0xff]  ;;  %v1892_v56 = vpack.c.bf16 %v473_v48, %v467_v47 }
  0xc5   : > { %1937 = vmatpush1.bf16.msra.mxu0 %v1936_v59  ;;  %1875 = vmatprep.subr.bf16.mxu1 %v1874_v60  ;;  %v678_v55 = vld [vmem:[#allocation5 + $0xbd8] sm:$0xff]  ;;  %v1956_v57 = vpack.c.bf16 %v665_v51, %v659_v49  ;;  %v1894_v58 = vpack.c.bf16 %v486_v53, %v480_v52  ;;  %v479_v59 = vld [vmem:[#allocation5 + $0x5a0] sm:$0xff]  ;;  %v485_v60 = vld [vmem:[#allocation5 + $0x5d0] sm:$0xff] }
  0xc6   : > { %1939 = vmatprep.subr.bf16.mxu0 %v1938_v0  ;;  %v671_v61 = vld [vmem:[#allocation5 + $0xba0] sm:$0xff]  ;;  %v1958_v62 = vpack.c.bf16 %v678_v55, %v672_v54  ;;  %v677_v63 = vld [vmem:[#allocation5 + $0xbd0] sm:$0xff]  ;;  %v302_v0 = vld [vmem:[#allocation5 + $0x18] sm:$0xff]  ;;  %v1896_v4 = vpack.c.bf16 %v485_v60, %v479_v59 }
  0xc7   : > { %v308_v1 = vld [vmem:[#allocation5 + $0x48] sm:$0xff]  ;;  %v690_v3 = vld [vmem:[#allocation5 + $0xc38] sm:$0xff]  ;;  %v1960_v5 = vpack.c.bf16 %v677_v63, %v671_v61  ;;  %v683_v7 = vld [vmem:[#allocation5 + $0xc00] sm:$0xff] }
  0xc8   : > { %1877 = vmatpush1.bf16.msra.mxu1 %v1876_v6  ;;  %v684_v2 = vld [vmem:[#allocation5 + $0xc08] sm:$0xff]  ;;  %v2026_v6 = vpack.c.bf16 %v308_v1, %v302_v0  ;;  %v689_v11 = vld [vmem:[#allocation5 + $0xc30] sm:$0xff]  ;;  %v314_v12 = vld [vmem:[#allocation5 + $0x78] sm:$0xff] }
  0xc9   : > { %1941 = vmatpush1.bf16.msra.mxu0 %v1940_v8  ;;  %1879 = vmatprep.subr.bf16.mxu1 %v1878_v9  ;;  %v301_v8 = vld [vmem:[#allocation5 + $0x10] sm:$0xff]  ;;  %v307_v9 = vld [vmem:[#allocation5 + $0x40] sm:$0xff]  ;;  %v1962_v10 = vpack.c.bf16 %v690_v3, %v684_v2  ;;  %v696_v14 = vld [vmem:[#allocation5 + $0xc68] sm:$0xff] }
  0xca   : > { %1943 = vmatprep.subr.bf16.mxu0 %v1942_v13  ;;  %v320_v13 = vld [vmem:[#allocation5 + $0xa8] sm:$0xff]  ;;  %v702_v15 = vld [vmem:[#allocation5 + $0xc98] sm:$0xff]  ;;  %v3035_v17 = vld [vmem:[%s3012_s29] sm:$0xff] }
  0xcb   : > { %v295_v18 = vld [vmem:[%s3012_s29 + $0x10] sm:$0xff]  ;;  %v326_v28 = vld [vmem:[#allocation5 + $0xd8] sm:$0xff]  ;;  %v332_v29 = vld [vmem:[#allocation5 + $0x108] sm:$0xff] }
  0xcc   : > { %1881 = vmatpush1.bf16.msra.mxu1 %v1880_v20  ;;  %v2028_v20 = vpack.c.bf16 %v307_v9, %v301_v8  ;;  %v695_v23 = vld [vmem:[#allocation5 + $0xc60] sm:$0xff]  ;;  %v313_v24 = vld [vmem:[#allocation5 + $0x70] sm:$0xff]  ;;  %v708_v30 = vld [vmem:[#allocation5 + $0xcc8] sm:$0xff] }
  0xcd   : > { %1945 = vmatpush1.bf16.msra.mxu0 %v1944_v21  ;;  %1883 = vmatprep.subr.bf16.mxu1 %v1882_v22  ;;  %v1964_v21 = vpack.c.bf16 %v689_v11, %v683_v7  ;;  %v2030_v22 = vpack.c.bf16 %v320_v13, %v314_v12  ;;  %v319_v25 = vld [vmem:[#allocation5 + $0xa0] sm:$0xff]  ;;  %v701_v27 = vld [vmem:[#allocation5 + $0xc90] sm:$0xff]  ;;  %v714_v31 = vld [vmem:[#allocation5 + $0xcf8] sm:$0xff] }
  0xce   : > { %1947 = vmatprep.subr.bf16.mxu0 %v1946_v26  ;;  %v1966_v26 = vpack.c.bf16 %v702_v15, %v696_v14  ;;  %v707_v35 = vld [vmem:[#allocation5 + $0xcc0] sm:$0xff]  ;;  %v325_v36 = vld [vmem:[#allocation5 + $0xd0] sm:$0xff]  ;;  %v338_v40 = vld [vmem:[#allocation5 + $0x138] sm:$0xff] }
  0xcf   : > { %v331_v37 = vld [vmem:[#allocation5 + $0x100] sm:$0xff]  ;;  %v713_v39 = vld [vmem:[#allocation5 + $0xcf0] sm:$0xff]  ;;  %v344_v41 = vld [vmem:[#allocation5 + $0x168] sm:$0xff] }
  0xd0   : > { %1885 = vmatpush1.bf16.msra.mxu1 %v1884_v32  ;;  %v2032_v32 = vpack.c.bf16 %v319_v25, %v313_v24  ;;  %v720_v42 = vld [vmem:[#allocation5 + $0xd28] sm:$0xff]  ;;  %v726_v43 = vld [vmem:[#allocation5 + $0xd58] sm:$0xff]  ;;  %v719_v47 = vld [vmem:[#allocation5 + $0xd20] sm:$0xff] }
  0xd1   : > { %1949 = vmatpush1.bf16.msra.mxu0 %v1948_v33  ;;  %1887 = vmatprep.subr.bf16.mxu1 %v1886_v34  ;;  %v1968_v33 = vpack.c.bf16 %v701_v27, %v695_v23  ;;  %v2034_v34 = vpack.c.bf16 %v332_v29, %v326_v28  ;;  %v337_v48 = vld [vmem:[#allocation5 + $0x130] sm:$0xff]  ;;  %v343_v49 = vld [vmem:[#allocation5 + $0x160] sm:$0xff]  ;;  %v350_v52 = vld [vmem:[#allocation5 + $0x198] sm:$0xff] }
  0xd2   : > { %1951 = vmatprep.subr.bf16.mxu0 %v1950_v38  ;;  %v1970_v38 = vpack.c.bf16 %v714_v31, %v708_v30  ;;  %v725_v51 = vld [vmem:[#allocation5 + $0xd50] sm:$0xff]  ;;  %v356_v53 = vld [vmem:[#allocation5 + $0x1c8] sm:$0xff]  ;;  %v738_v55 = vld [vmem:[#allocation5 + $0xdb8] sm:$0xff] }
  0xd3   : > { %v732_v54 = vld [vmem:[#allocation5 + $0xd88] sm:$0xff]  ;;  %v731_v59 = vld [vmem:[#allocation5 + $0xd80] sm:$0xff]  ;;  %v349_v60 = vld [vmem:[#allocation5 + $0x190] sm:$0xff] }
  0xd4   : > { %1889 = vmatpush1.bf16.msra.mxu1 %v1888_v44  ;;  %v2036_v44 = vpack.c.bf16 %v331_v37, %v325_v36  ;;  %v355_v61 = vld [vmem:[#allocation5 + $0x1c0] sm:$0xff]  ;;  %v737_v63 = vld [vmem:[#allocation5 + $0xdb0] sm:$0xff]  ;;  %v362_v0 = vld [vmem:[#allocation5 + $0x1f8] sm:$0xff] }
  0xd5   : > { %1953 = vmatpush1.bf16.msra.mxu0 %v1952_v45  ;;  %1891 = vmatprep.subr.bf16.mxu1 %v1890_v46  ;;  %v1972_v45 = vpack.c.bf16 %v713_v39, %v707_v35  ;;  %v2038_v46 = vpack.c.bf16 %v344_v41, %v338_v40  ;;  %v368_v1 = vld [vmem:[#allocation5 + $0x228] sm:$0xff]  ;;  %v750_v3 = vld [vmem:[#allocation5 + $0xe18] sm:$0xff]  ;;  %v743_v7 = vld [vmem:[#allocation5 + $0xde0] sm:$0xff] }
  0xd6   : > { %1955 = vmatprep.subr.bf16.mxu0 %v1954_v50  ;;  %v1974_v50 = vpack.c.bf16 %v726_v43, %v720_v42  ;;  %v744_v2 = vld [vmem:[#allocation5 + $0xde8] sm:$0xff]  ;;  %v361_v8 = vld [vmem:[#allocation5 + $0x1f0] sm:$0xff]  ;;  %v367_v9 = vld [vmem:[#allocation5 + $0x220] sm:$0xff] }
  0xd7   : > { %v749_v11 = vld [vmem:[#allocation5 + $0xe10] sm:$0xff]  ;;  %v374_v12 = vld [vmem:[#allocation5 + $0x258] sm:$0xff]  ;;  %v380_v13 = vld [vmem:[#allocation5 + $0x288] sm:$0xff] }
  0xd8   : > { %1893 = vmatpush1.bf16.msra.mxu1 %v1892_v56  ;;  %v2040_v56 = vpack.c.bf16 %v343_v49, %v337_v48  ;;  %v756_v14 = vld [vmem:[#allocation5 + $0xe48] sm:$0xff]  ;;  %v762_v15 = vld [vmem:[#allocation5 + $0xe78] sm:$0xff]  ;;  %v761_v23 = vld [vmem:[#allocation5 + $0xe70] sm:$0xff] }
  0xd9   : > { %1957 = vmatpush1.bf16.msra.mxu0 %v1956_v57  ;;  %1895 = vmatprep.subr.bf16.mxu1 %v1894_v58  ;;  %v1976_v57 = vpack.c.bf16 %v725_v51, %v719_v47  ;;  %v2042_v58 = vpack.c.bf16 %v356_v53, %v350_v52  ;;  %v373_v24 = vld [vmem:[#allocation5 + $0x250] sm:$0xff]  ;;  %v379_v25 = vld [vmem:[#allocation5 + $0x280] sm:$0xff]  ;;  %v386_v27 = vld [vmem:[#allocation5 + $0x2b8] sm:$0xff] }
  0xda   : > { %1959 = vmatprep.subr.bf16.mxu0 %v1958_v62  ;;  %v1978_v62 = vpack.c.bf16 %v738_v55, %v732_v54  ;;  %v392_v28 = vld [vmem:[#allocation5 + $0x2e8] sm:$0xff]  ;;  %v774_v31 = vld [vmem:[#allocation5 + $0xed8] sm:$0xff]  ;;  %v767_v35 = vld [vmem:[#allocation5 + $0xea0] sm:$0xff] }
  0xdb   : > { %v3041_v29 = vld [vmem:[%s3012_s29 + $0x28] sm:$0xff]  ;;  %v385_v36 = vld [vmem:[#allocation5 + $0x2b0] sm:$0xff]  ;;  %v391_v37 = vld [vmem:[#allocation5 + $0x2e0] sm:$0xff] }
  0xdc   : > { %1897 = vmatpush1.bf16.msra.mxu1 %v1896_v4  ;;  %v2044_v4 = vpack.c.bf16 %v355_v61, %v349_v60  ;;  %v768_v30 = vld [vmem:[#allocation5 + $0xea8] sm:$0xff]  ;;  %v773_v39 = vld [vmem:[#allocation5 + $0xed0] sm:$0xff]  ;;  %v398_v40 = vld [vmem:[#allocation5 + $0x318] sm:$0xff] }
  0xdd   : > { %1961 = vmatpush1.bf16.msra.mxu0 %v1960_v5  ;;  %2027 = vmatprep.subr.bf16.mxu1 %v2026_v6  ;;  %v1980_v5 = vpack.c.bf16 %v737_v63, %v731_v59  ;;  %v2046_v6 = vpack.c.bf16 %v368_v1, %v362_v0  ;;  %v404_v41 = vld [vmem:[#allocation5 + $0x348] sm:$0xff]  ;;  %v786_v43 = vld [vmem:[#allocation5 + $0xf38] sm:$0xff]  ;;  %v779_v47 = vld [vmem:[#allocation5 + $0xf00] sm:$0xff] }
  0xde   : > { %1963 = vmatprep.subr.bf16.mxu0 %v1962_v10  ;;  %v1982_v10 = vpack.c.bf16 %v750_v3, %v744_v2  ;;  %v780_v42 = vld [vmem:[#allocation5 + $0xf08] sm:$0xff]  ;;  %v397_v48 = vld [vmem:[#allocation5 + $0x310] sm:$0xff]  ;;  %v403_v49 = vld [vmem:[#allocation5 + $0x340] sm:$0xff] }
  0xdf   : > { %972 = vmatmul.mubr.f32.vlgmr.msra.gmra.mrb[0].mxu1 %v3035_v17  ;;  %v785_v51 = vld [vmem:[#allocation5 + $0xf30] sm:$0xff]  ;;  %v410_v52 = vld [vmem:[#allocation5 + $0x378] sm:$0xff]  ;;  %v416_v53 = vld [vmem:[#allocation5 + $0x3a8] sm:$0xff] }
  0xe0   : > { %1043 = vmatmul.mubr.f32.vlgmr.msra.gmra.mrb[0].mxu0 %v295_v18  ;;  %2029 = vmatpush1.bf16.msra.mxu1 %v2028_v20  ;;  %v2048_v18 = vpack.c.bf16 %v367_v9, %v361_v8  ;;  %v755_v20 = vld [vmem:[#allocation5 + $0xe40] sm:$0xff]  ;;  %v792_v54 = vld [vmem:[#allocation5 + $0xf68] sm:$0xff]  ;;  %v798_v55 = vld [vmem:[#allocation5 + $0xf98] sm:$0xff] }
  0xe1   : > { %1965 = vmatpush1.bf16.msra.mxu0 %v1964_v21  ;;  %2031 = vmatprep.subr.bf16.mxu1 %v2030_v22  ;;  %v1984_v21 = vpack.c.bf16 %v749_v11, %v743_v7  ;;  %v2050_v22 = vpack.c.bf16 %v380_v13, %v374_v12  ;;  %v791_v59 = vld [vmem:[#allocation5 + $0xf60] sm:$0xff]  ;;  %v409_v60 = vld [vmem:[#allocation5 + $0x370] sm:$0xff]  ;;  %v422_v0 = vld [vmem:[#allocation5 + $0x3d8] sm:$0xff] }
  0xe2   : > { %1967 = vmatprep.subr.bf16.mxu0 %v1966_v26  ;;  %1184 = vmatprep.mubr.f32.mxu1 %v3027_v16  ;;  %v1986_v26 = vpack.c.bf16 %v762_v15, %v756_v14  ;;  %v415_v61 = vld [vmem:[#allocation5 + $0x3a0] sm:$0xff]  ;;  %v797_v63 = vld [vmem:[#allocation5 + $0xf90] sm:$0xff]  ;;  %v428_v1 = vld [vmem:[#allocation5 + $0x408] sm:$0xff] }
  0xe3   : > { %1113 = vmatprep.mubr.f32.mxu0 %v3041_v29  ;;  %v804_v2 = vld [vmem:[#allocation5 + $0xfc8] sm:$0xff]  ;;  %v810_v3 = vld [vmem:[#allocation5 + $0xff8] sm:$0xff]  ;;  %v803_v7 = vld [vmem:[#allocation5 + $0xfc0] sm:$0xff] }
  0xe4   : > { %2033 = vmatpush1.bf16.msra.mxu1 %v2032_v32  ;;  %v2052_v32 = vpack.c.bf16 %v379_v25, %v373_v24  ;;  %v421_v8 = vld [vmem:[#allocation5 + $0x3d0] sm:$0xff]  ;;  %v427_v9 = vld [vmem:[#allocation5 + $0x400] sm:$0xff]  ;;  %v434_v12 = vld [vmem:[#allocation5 + $0x438] sm:$0xff] }
  0xe5   : > { %1969 = vmatpush1.bf16.msra.mxu0 %v1968_v33  ;;  %2035 = vmatprep.subr.bf16.mxu1 %v2034_v34  ;;  %v1988_v33 = vpack.c.bf16 %v761_v23, %v755_v20  ;;  %v2054_v34 = vpack.c.bf16 %v392_v28, %v386_v27  ;;  %v809_v11 = vld [vmem:[#allocation5 + $0xff0] sm:$0xff]  ;;  %v440_v13 = vld [vmem:[#allocation5 + $0x468] sm:$0xff]  ;;  %v822_v15 = vld [vmem:[#allocation5 + $0x1058] sm:$0xff] }
  0xe6   : > { %1971 = vmatprep.subr.bf16.mxu0 %v1970_v38  ;;  %v1990_v38 = vpack.c.bf16 %v774_v31, %v768_v30  ;;  %v816_v14 = vld [vmem:[#allocation5 + $0x1028] sm:$0xff]  ;;  %v2004_v20 = vpack.c.bf16 %v809_v11, %v803_v7  ;;  %v433_v23 = vld [vmem:[#allocation5 + $0x430] sm:$0xff]  ;;  %v439_v24 = vld [vmem:[#allocation5 + $0x460] sm:$0xff] }
  0xe7   : > { %v2006_v25 = vpack.c.bf16 %v822_v15, %v816_v14  ;;  %v446_v27 = vld [vmem:[#allocation5 + $0x498] sm:$0xff]  ;;  %v452_v28 = vld [vmem:[#allocation5 + $0x4c8] sm:$0xff]  ;;  %v863_v7 = vld [vmem:[#allocation5 + $0x11a0] sm:$0xff] }
  0xe8   : > { %2037 = vmatpush1.bf16.msra.mxu1 %v2036_v44  ;;  %v2056_v44 = vpack.c.bf16 %v391_v37, %v385_v36  ;;  %v828_v30 = vld [vmem:[#allocation5 + $0x1088] sm:$0xff]  ;;  %v834_v31 = vld [vmem:[#allocation5 + $0x10b8] sm:$0xff]  ;;  %v445_v36 = vld [vmem:[#allocation5 + $0x490] sm:$0xff] }
  0xe9   : > { %1973 = vmatpush1.bf16.msra.mxu0 %v1972_v45  ;;  %2039 = vmatprep.subr.bf16.mxu1 %v2038_v46  ;;  %v1992_v45 = vpack.c.bf16 %v773_v39, %v767_v35  ;;  %v2058_v46 = vpack.c.bf16 %v404_v41, %v398_v40  ;;  %v827_v35 = vld [vmem:[#allocation5 + $0x1080] sm:$0xff]  ;;  %v833_v39 = vld [vmem:[#allocation5 + $0x10b0] sm:$0xff]  ;;  %v458_v40 = vld [vmem:[#allocation5 + $0x4f8] sm:$0xff] }
  0xea   : > { %1975 = vmatprep.subr.bf16.mxu0 %v1974_v50  ;;  %v1994_v50 = vpack.c.bf16 %v786_v43, %v780_v42  ;;  %v451_v37 = vld [vmem:[#allocation5 + $0x4c0] sm:$0xff]  ;;  %v464_v41 = vld [vmem:[#allocation5 + $0x528] sm:$0xff]  ;;  %v846_v43 = vld [vmem:[#allocation5 + $0x1118] sm:$0xff] }
  0xeb   : > { %v840_v42 = vld [vmem:[#allocation5 + $0x10e8] sm:$0xff]  ;;  %v869_v11 = vld [vmem:[#allocation5 + $0x11d0] sm:$0xff]  ;;  %v310_v15 = vld [vmem:[#allocation5 + $0x58] sm:$0xff] }
  0xec   : > { %2041 = vmatpush1.bf16.msra.mxu1 %v2040_v56  ;;  %v2060_v56 = vpack.c.bf16 %v403_v49, %v397_v48  ;;  %v457_v48 = vld [vmem:[#allocation5 + $0x4f0] sm:$0xff]  ;;  %v463_v49 = vld [vmem:[#allocation5 + $0x520] sm:$0xff]  ;;  %v304_v14 = vld [vmem:[#allocation5 + $0x28] sm:$0xff] }
  0xed   : > { %1977 = vmatpush1.bf16.msra.mxu0 %v1976_v57  ;;  %2043 = vmatprep.subr.bf16.mxu1 %v2042_v58  ;;  %v1996_v57 = vpack.c.bf16 %v785_v51, %v779_v47  ;;  %v2062_v58 = vpack.c.bf16 %v416_v53, %v410_v52  ;;  %v839_v47 = vld [vmem:[#allocation5 + $0x10e0] sm:$0xff]  ;;  %v845_v51 = vld [vmem:[#allocation5 + $0x1110] sm:$0xff]  ;;  %v470_v52 = vld [vmem:[#allocation5 + $0x558] sm:$0xff] }
  0xee   : > { %1979 = vmatprep.subr.bf16.mxu0 %v1978_v62  ;;  %v1998_v62 = vpack.c.bf16 %v798_v55, %v792_v54  ;;  %v476_v53 = vld [vmem:[#allocation5 + $0x588] sm:$0xff]  ;;  %v858_v55 = vld [vmem:[#allocation5 + $0x1178] sm:$0xff] }
  0xef   : > { %v852_v54 = vld [vmem:[#allocation5 + $0x1148] sm:$0xff] }
  0xf0   : > { %2045 = vmatpush1.bf16.msra.mxu1 %v2044_v4  ;;  %v2064_v4 = vpack.c.bf16 %v415_v61, %v409_v60  ;;  %v469_v60 = vld [vmem:[#allocation5 + $0x550] sm:$0xff]  ;;  %v475_v61 = vld [vmem:[#allocation5 + $0x580] sm:$0xff] }
  0xf1   : > { %1981 = vmatpush1.bf16.msra.mxu0 %v1980_v5  ;;  %2047 = vmatprep.subr.bf16.mxu1 %v2046_v6  ;;  %v2000_v5 = vpack.c.bf16 %v797_v63, %v791_v59  ;;  %v2066_v6 = vpack.c.bf16 %v428_v1, %v422_v0  ;;  %v851_v59 = vld [vmem:[#allocation5 + $0x1140] sm:$0xff]  ;;  %v857_v63 = vld [vmem:[#allocation5 + $0x1170] sm:$0xff]  ;;  %v482_v0 = vld [vmem:[#allocation5 + $0x5b8] sm:$0xff] }
  0xf2   : > { %1983 = vmatprep.subr.bf16.mxu0 %v1982_v10  ;;  %v2002_v10 = vpack.c.bf16 %v810_v3, %v804_v2  ;;  %v488_v1 = vld [vmem:[#allocation5 + $0x5e8] sm:$0xff]  ;;  %v870_v3 = vld [vmem:[#allocation5 + $0x11d8] sm:$0xff] }
  0xf3   : > { %v864_v2 = vld [vmem:[#allocation5 + $0x11a8] sm:$0xff] }
  0xf4   : > { %2049 = vmatpush1.bf16.msra.mxu1 %v2048_v18  ;;  %v2068_v18 = vpack.c.bf16 %v427_v9, %v421_v8  ;;  %v481_v8 = vld [vmem:[#allocation5 + $0x5b0] sm:$0xff]  ;;  %v487_v9 = vld [vmem:[#allocation5 + $0x5e0] sm:$0xff] }
  0xf5   : > { %1985 = vmatpush1.bf16.msra.mxu0 %v1984_v21  ;;  %2051 = vmatprep.subr.bf16.mxu1 %v2050_v22  ;;  %v2070_v21 = vpack.c.bf16 %v440_v13, %v434_v12  ;;  %v815_v22 = vld [vmem:[#allocation5 + $0x1020] sm:$0xff]  ;;  %v494_v12 = vld [vmem:[#allocation5 + $0x618] sm:$0xff]  ;;  %v500_v13 = vld [vmem:[#allocation5 + $0x648] sm:$0xff] }
  0xf6   : > { %1987 = vmatprep.subr.bf16.mxu0 %v1986_v26  ;;  %v821_v26 = vld [vmem:[#allocation5 + $0x1050] sm:$0xff] }
  0xf8   : > { %2053 = vmatpush1.bf16.msra.mxu1 %v2052_v32  ;;  %v2072_v32 = vpack.c.bf16 %v439_v24, %v433_v23  ;;  %v499_v23 = vld [vmem:[#allocation5 + $0x640] sm:$0xff] }
  0xf9   : > { %1989 = vmatpush1.bf16.msra.mxu0 %v1988_v33  ;;  %2055 = vmatprep.subr.bf16.mxu1 %v2054_v34  ;;  %v2008_v33 = vpack.c.bf16 %v821_v26, %v815_v22  ;;  %v2074_v34 = vpack.c.bf16 %v452_v28, %v446_v27  ;;  %v493_v22 = vld [vmem:[#allocation5 + $0x610] sm:$0xff]  ;;  %v303_v24 = vld [vmem:[#allocation5 + $0x20] sm:$0xff]  ;;  %v506_v27 = vld [vmem:[#allocation5 + $0x678] sm:$0xff] }
  0xfa   : > { %1991 = vmatprep.subr.bf16.mxu0 %v1990_v38  ;;  %v2010_v38 = vpack.c.bf16 %v834_v31, %v828_v30  ;;  %v309_v26 = vld [vmem:[#allocation5 + $0x50] sm:$0xff]  ;;  %v512_v28 = vld [vmem:[#allocation5 + $0x6a8] sm:$0xff]  ;;  %v322_v31 = vld [vmem:[#allocation5 + $0xb8] sm:$0xff] }
  0xfb   : > { %v316_v30 = vld [vmem:[#allocation5 + $0x88] sm:$0xff] }
  0xfc   : > { %2057 = vmatpush1.bf16.msra.mxu1 %v2056_v44  ;;  %v2076_v44 = vpack.c.bf16 %v451_v37, %v445_v36  ;;  %v505_v36 = vld [vmem:[#allocation5 + $0x670] sm:$0xff]  ;;  %v511_v37 = vld [vmem:[#allocation5 + $0x6a0] sm:$0xff] }
  0xfd   : > { %1993 = vmatpush1.bf16.msra.mxu0 %v1992_v45  ;;  %2059 = vmatprep.subr.bf16.mxu1 %v2058_v46  ;;  %v2012_v45 = vpack.c.bf16 %v833_v39, %v827_v35  ;;  %v2078_v46 = vpack.c.bf16 %v464_v41, %v458_v40  ;;  %v2094_v35 = vpack.c.bf16 %v512_v28, %v506_v27  ;;  %v321_v40 = vld [vmem:[#allocation5 + $0xb0] sm:$0xff]  ;;  %v518_v41 = vld [vmem:[#allocation5 + $0x6d8] sm:$0xff]  ;;  %v376_v27 = vld [vmem:[#allocation5 + $0x268] sm:$0xff] }
  0xfe   : > { %1995 = vmatprep.subr.bf16.mxu0 %v1994_v50  ;;  %v2014_v50 = vpack.c.bf16 %v846_v43, %v840_v42  ;;  %v2222_v39 = vpack.c.bf16 %v322_v31, %v316_v30  ;;  %v524_v42 = vld [vmem:[#allocation5 + $0x708] sm:$0xff]  ;;  %v382_v28 = vld [vmem:[#allocation5 + $0x298] sm:$0xff] }
  0xff   : > { %v328_v43 = vld [vmem:[#allocation5 + $0xe8] sm:$0xff] }
 0x100   : > { %2061 = vmatpush1.bf16.msra.mxu1 %v2060_v56  ;;  %v2080_v56 = vpack.c.bf16 %v463_v49, %v457_v48  ;;  %v517_v48 = vld [vmem:[#allocation5 + $0x6d0] sm:$0xff]  ;;  %v523_v49 = vld [vmem:[#allocation5 + $0x700] sm:$0xff] }
 0x101   : > { %1997 = vmatpush1.bf16.msra.mxu0 %v1996_v57  ;;  %2063 = vmatprep.subr.bf16.mxu1 %v2062_v58  ;;  %v2016_v57 = vpack.c.bf16 %v845_v51, %v839_v47  ;;  %v2082_v58 = vpack.c.bf16 %v476_v53, %v470_v52  ;;  %v2098_v47 = vpack.c.bf16 %v524_v42, %v518_v41  ;;  %v333_v52 = vld [vmem:[#allocation5 + $0x110] sm:$0xff]  ;;  %v530_v53 = vld [vmem:[#allocation5 + $0x738] sm:$0xff] }
 0x102   : > { %1999 = vmatprep.subr.bf16.mxu0 %v1998_v62  ;;  %v2018_v62 = vpack.c.bf16 %v858_v55, %v852_v54  ;;  %v536_v54 = vld [vmem:[#allocation5 + $0x768] sm:$0xff]  ;;  %v346_v55 = vld [vmem:[#allocation5 + $0x178] sm:$0xff] }
 0x103   : > { %v394_v41 = vld [vmem:[#allocation5 + $0x2f8] sm:$0xff] }
 0x104   : > { %2065 = vmatpush1.bf16.msra.mxu1 %v2064_v4  ;;  %v2084_v4 = vpack.c.bf16 %v475_v61, %v469_v60  ;;  %v535_v60 = vld [vmem:[#allocation5 + $0x760] sm:$0xff] }
 0x105   : > { %2001 = vmatpush1.bf16.msra.mxu0 %v2000_v5  ;;  %2067 = vmatprep.subr.bf16.mxu1 %v2066_v6  ;;  %v2020_v5 = vpack.c.bf16 %v857_v63, %v851_v59  ;;  %v2086_v6 = vpack.c.bf16 %v488_v1, %v482_v0  ;;  %v529_v59 = vld [vmem:[#allocation5 + $0x730] sm:$0xff]  ;;  %v339_v61 = vld [vmem:[#allocation5 + $0x140] sm:$0xff]  ;;  %v542_v0 = vld [vmem:[#allocation5 + $0x798] sm:$0xff] }
 0x106   : > { %2003 = vmatprep.subr.bf16.mxu0 %v2002_v10  ;;  %v2022_v10 = vpack.c.bf16 %v870_v3, %v864_v2  ;;  %v345_v63 = vld [vmem:[#allocation5 + $0x170] sm:$0xff]  ;;  %v548_v1 = vld [vmem:[#allocation5 + $0x7c8] sm:$0xff]  ;;  %v2104_v3 = vpack.c.bf16 %v535_v60, %v529_v59 }
 0x107   : > { %v352_v2 = vld [vmem:[#allocation5 + $0x1a8] sm:$0xff]  ;;  %v405_v60 = vld [vmem:[#allocation5 + $0x350] sm:$0xff] }
 0x108   : > { %2069 = vmatpush1.bf16.msra.mxu1 %v2068_v18  ;;  %v2088_v18 = vpack.c.bf16 %v487_v9, %v481_v8  ;;  %v357_v9 = vld [vmem:[#allocation5 + $0x1d0] sm:$0xff] }
 0x109   : > { %2005 = vmatpush1.bf16.msra.mxu0 %v2004_v20  ;;  %2071 = vmatprep.subr.bf16.mxu1 %v2070_v21  ;;  %v2024_v20 = vpack.c.bf16 %v869_v11, %v863_v7  ;;  %v2090_v21 = vpack.c.bf16 %v500_v13, %v494_v12  ;;  %v351_v7 = vld [vmem:[#allocation5 + $0x1a0] sm:$0xff]  ;;  %v560_v11 = vld [vmem:[#allocation5 + $0x828] sm:$0xff]  ;;  %v370_v13 = vld [vmem:[#allocation5 + $0x238] sm:$0xff] }
 0x10a   : > { %2007 = vmatprep.subr.bf16.mxu0 %v2006_v25  ;;  %v2218_v25 = vpack.c.bf16 %v310_v15, %v304_v14  ;;  %v364_v12 = vld [vmem:[#allocation5 + $0x208] sm:$0xff]  ;;  %v2236_v15 = vpack.c.bf16 %v357_v9, %v351_v7  ;;  %v614_v7 = vld [vmem:[#allocation5 + $0x9d8] sm:$0xff] }
 0x10b   : > { %v424_v9 = vld [vmem:[#allocation5 + $0x3e8] sm:$0xff] }
 0x10c   : > { %2073 = vmatpush1.bf16.msra.mxu1 %v2072_v32  ;;  %v297_v32 = vld [vmem:[%s3012_s29 + $0x20] sm:$0xff] }
 0x10d   : > { %2009 = vmatpush1.bf16.msra.mxu0 %v2008_v33  ;;  %2075 = vmatprep.subr.bf16.mxu1 %v2074_v34  ;;  %v2092_v33 = vpack.c.bf16 %v499_v23, %v493_v22  ;;  %v2220_v34 = vpack.c.bf16 %v309_v26, %v303_v24  ;;  %v363_v22 = vld [vmem:[#allocation5 + $0x200] sm:$0xff]  ;;  %v2238_v23 = vpack.c.bf16 %v370_v13, %v364_v12  ;;  %v369_v24 = vld [vmem:[#allocation5 + $0x230] sm:$0xff]  ;;  %v572_v26 = vld [vmem:[#allocation5 + $0x888] sm:$0xff] }
 0x10e   : > { %2011 = vmatprep.subr.bf16.mxu0 %v2010_v38  ;;  %v315_v38 = vld [vmem:[#allocation5 + $0x80] sm:$0xff]  ;;  %v2240_v31 = vpack.c.bf16 %v369_v24, %v363_v22  ;;  %v626_v22 = vld [vmem:[#allocation5 + $0xa38] sm:$0xff]  ;;  %v436_v24 = vld [vmem:[#allocation5 + $0x448] sm:$0xff] }
 0x110   : > { %2077 = vmatpush1.bf16.msra.mxu1 %v2076_v44  ;;  %v334_v44 = vld [vmem:[#allocation5 + $0x118] sm:$0xff] }
 0x111   : > { %2013 = vmatpush1.bf16.msra.mxu0 %v2012_v45  ;;  %2079 = vmatprep.subr.bf16.mxu1 %v2078_v46  ;;  %v2096_v45 = vpack.c.bf16 %v511_v37, %v505_v36  ;;  %v2224_v46 = vpack.c.bf16 %v321_v40, %v315_v38  ;;  %v2226_v51 = vpack.c.bf16 %v334_v44, %v328_v43  ;;  %v381_v37 = vld [vmem:[#allocation5 + $0x290] sm:$0xff]  ;;  %v578_v38 = vld [vmem:[#allocation5 + $0x8b8] sm:$0xff]  ;;  %v388_v40 = vld [vmem:[#allocation5 + $0x2c8] sm:$0xff] }
 0x112   : > { %2015 = vmatprep.subr.bf16.mxu0 %v2014_v50  ;;  %v327_v50 = vld [vmem:[#allocation5 + $0xe0] sm:$0xff]  ;;  %v2242_v36 = vpack.c.bf16 %v382_v28, %v376_v27 }
 0x114   : > { %2081 = vmatpush1.bf16.msra.mxu1 %v2080_v56  ;;  %v2100_v56 = vpack.c.bf16 %v523_v49, %v517_v48  ;;  %v2246_v48 = vpack.c.bf16 %v394_v41, %v388_v40  ;;  %v393_v49 = vld [vmem:[#allocation5 + $0x2f0] sm:$0xff] }
 0x115   : > { %2017 = vmatpush1.bf16.msra.mxu0 %v2016_v57  ;;  %2083 = vmatprep.subr.bf16.mxu1 %v2082_v58  ;;  %v2228_v57 = vpack.c.bf16 %v333_v52, %v327_v50  ;;  %v2102_v58 = vpack.c.bf16 %v536_v54, %v530_v53  ;;  %v590_v50 = vld [vmem:[#allocation5 + $0x918] sm:$0xff]  ;;  %v400_v52 = vld [vmem:[#allocation5 + $0x328] sm:$0xff] }
 0x116   : > { %2019 = vmatprep.subr.bf16.mxu0 %v2018_v62  ;;  %v406_v53 = vld [vmem:[#allocation5 + $0x358] sm:$0xff] }
 0x117   : > { %v2250_v59 = vpack.c.bf16 %v406_v53, %v400_v52 }
 0x118   : > { %2085 = vmatpush1.bf16.msra.mxu1 %v2084_v4  ;;  %v2106_v4 = vpack.c.bf16 %v548_v1, %v542_v0  ;;  %v418_v0 = vld [vmem:[#allocation5 + $0x3b8] sm:$0xff] }
 0x119   : > { %2021 = vmatpush1.bf16.msra.mxu0 %v2020_v5  ;;  %2087 = vmatprep.subr.bf16.mxu1 %v2086_v6  ;;  %v541_v5 = vld [vmem:[#allocation5 + $0x790] sm:$0xff]  ;;  %v547_v6 = vld [vmem:[#allocation5 + $0x7c0] sm:$0xff] }
 0x11a   : > { %2023 = vmatprep.subr.bf16.mxu0 %v2022_v10  ;;  %v554_v10 = vld [vmem:[#allocation5 + $0x7f8] sm:$0xff]  ;;  %v2108_v14 = vpack.c.bf16 %v547_v6, %v541_v5  ;;  %v417_v6 = vld [vmem:[#allocation5 + $0x3b0] sm:$0xff] }
 0x11c   : > { %2089 = vmatpush1.bf16.msra.mxu1 %v2088_v18  ;;  %v2110_v18 = vpack.c.bf16 %v560_v11, %v554_v10  ;;  %v430_v10 = vld [vmem:[#allocation5 + $0x418] sm:$0xff] }
 0x11d   : > { %2025 = vmatpush1.bf16.msra.mxu0 %v2024_v20  ;;  %2091 = vmatprep.subr.bf16.mxu1 %v2090_v21  ;;  %v553_v20 = vld [vmem:[#allocation5 + $0x7f0] sm:$0xff]  ;;  %v559_v21 = vld [vmem:[#allocation5 + $0x820] sm:$0xff] }
 0x11e   : > { %2219 = vmatprep.subr.bf16.mxu0 %v2218_v25  ;;  %v566_v25 = vld [vmem:[#allocation5 + $0x858] sm:$0xff]  ;;  %v2112_v30 = vpack.c.bf16 %v559_v21, %v553_v20  ;;  %v2258_v20 = vpack.c.bf16 %v430_v10, %v424_v9  ;;  %v429_v21 = vld [vmem:[#allocation5 + $0x410] sm:$0xff] }
 0x11f   : > { %1185 = vmatmul.mubr.f32.vlgmr.msra.gmra.mrb[2].mxu1 %v3035_v17  ;;  %v340_v17 = vld [vmem:[#allocation5 + $0x148] sm:$0xff] }
 0x120   : > { %1114 = vmatmul.mubr.f32.vlgmr.msra.gmra.mrb[0].mxu0 %v297_v32  ;;  %2093 = vmatpush1.bf16.msra.mxu1 %v2092_v33  ;;  %v2230_v62 = vpack.c.bf16 %v346_v55, %v340_v17  ;;  %v2114_v32 = vpack.c.bf16 %v572_v26, %v566_v25  ;;  %v565_v33 = vld [vmem:[#allocation5 + $0x850] sm:$0xff]  ;;  %v442_v25 = vld [vmem:[#allocation5 + $0x478] sm:$0xff] }
 0x121   : > { %2221 = vmatpush1.bf16.msra.mxu0 %v2220_v34  ;;  %2095 = vmatprep.subr.bf16.mxu1 %v2094_v35  ;;  %v571_v34 = vld [vmem:[#allocation5 + $0x880] sm:$0xff] }
 0x122   : > { %2223 = vmatprep.subr.bf16.mxu0 %v2222_v39  ;;  %1255 = vmatprep.mubr.f32.mxu1 %v3031_v19  ;;  %v358_v19 = vld [vmem:[#allocation5 + $0x1d8] sm:$0xff]  ;;  %v375_v35 = vld [vmem:[#allocation5 + $0x260] sm:$0xff]  ;;  %v584_v39 = vld [vmem:[#allocation5 + $0x8e8] sm:$0xff]  ;;  %v2116_v42 = vpack.c.bf16 %v571_v34, %v565_v33  ;;  %v2262_v33 = vpack.c.bf16 %v442_v25, %v436_v24 }
 0x123   : > { %1397 = vmatprep.mubr.f32.mxu0 %v3027_v16  ;;  %v2232_v16 = vpack.c.bf16 %v345_v63, %v339_v61  ;;  %v2234_v8 = vpack.c.bf16 %v358_v19, %v352_v2  ;;  %v2244_v43 = vpack.c.bf16 %v381_v37, %v375_v35  ;;  %v2118_v44 = vpack.c.bf16 %v584_v39, %v578_v38  ;;  %v602_v61 = vld [vmem:[#allocation5 + $0x978] sm:$0xff]  ;;  %v412_v63 = vld [vmem:[#allocation5 + $0x388] sm:$0xff]  ;;  %v441_v34 = vld [vmem:[#allocation5 + $0x470] sm:$0xff] }
 0x124   : > { %2097 = vmatpush1.bf16.msra.mxu1 %v2096_v45  ;;  %v577_v45 = vld [vmem:[#allocation5 + $0x8b0] sm:$0xff]  ;;  %v2254_v5 = vpack.c.bf16 %v418_v0, %v412_v63  ;;  %v638_v35 = vld [vmem:[#allocation5 + $0xa98] sm:$0xff]  ;;  %v448_v37 = vld [vmem:[#allocation5 + $0x4a8] sm:$0xff] }
 0x125   : > { %2225 = vmatpush1.bf16.msra.mxu0 %v2224_v46  ;;  %2099 = vmatprep.subr.bf16.mxu1 %v2098_v47  ;;  %v583_v46 = vld [vmem:[#allocation5 + $0x8e0] sm:$0xff]  ;;  %v454_v38 = vld [vmem:[#allocation5 + $0x4d8] sm:$0xff] }
 0x126   : > { %2227 = vmatprep.subr.bf16.mxu0 %v2226_v51  ;;  %v387_v47 = vld [vmem:[#allocation5 + $0x2c0] sm:$0xff]  ;;  %v596_v51 = vld [vmem:[#allocation5 + $0x948] sm:$0xff]  ;;  %v2120_v54 = vpack.c.bf16 %v583_v46, %v577_v45  ;;  %v2266_v45 = vpack.c.bf16 %v454_v38, %v448_v37  ;;  %v453_v46 = vld [vmem:[#allocation5 + $0x4d0] sm:$0xff] }
 0x127   : > { %v2248_v17 = vpack.c.bf16 %v393_v49, %v387_v47  ;;  %v2122_v55 = vpack.c.bf16 %v596_v51, %v590_v50  ;;  %v650_v47 = vld [vmem:[#allocation5 + $0xaf8] sm:$0xff]  ;;  %v460_v49 = vld [vmem:[#allocation5 + $0x508] sm:$0xff] }
 0x128   : > { %2101 = vmatpush1.bf16.msra.mxu1 %v2100_v56  ;;  %v589_v56 = vld [vmem:[#allocation5 + $0x910] sm:$0xff]  ;;  %v466_v50 = vld [vmem:[#allocation5 + $0x538] sm:$0xff] }
 0x129   : > { %2229 = vmatpush1.bf16.msra.mxu0 %v2228_v57  ;;  %2103 = vmatprep.subr.bf16.mxu1 %v2102_v58  ;;  %v595_v57 = vld [vmem:[#allocation5 + $0x940] sm:$0xff] }
 0x12a   : > { %2231 = vmatprep.subr.bf16.mxu0 %v2230_v62  ;;  %v399_v58 = vld [vmem:[#allocation5 + $0x320] sm:$0xff]  ;;  %v608_v62 = vld [vmem:[#allocation5 + $0x9a8] sm:$0xff]  ;;  %v2124_v1 = vpack.c.bf16 %v595_v57, %v589_v56  ;;  %v2270_v56 = vpack.c.bf16 %v466_v50, %v460_v49  ;;  %v465_v57 = vld [vmem:[#allocation5 + $0x530] sm:$0xff] }
 0x12b   : > { %v2252_v2 = vpack.c.bf16 %v405_v60, %v399_v58  ;;  %v2126_v19 = vpack.c.bf16 %v608_v62, %v602_v61  ;;  %v662_v58 = vld [vmem:[#allocation5 + $0xb58] sm:$0xff]  ;;  %v472_v60 = vld [vmem:[#allocation5 + $0x568] sm:$0xff]  ;;  %v2536_v49 = vld [vmem:[%s3012_s29] sm:$0xff] }
 0x12c   : > { %2105 = vmatpush1.bf16.msra.mxu1 %v2104_v3  ;;  %v601_v3 = vld [vmem:[#allocation5 + $0x970] sm:$0xff]  ;;  %v478_v61 = vld [vmem:[#allocation5 + $0x598] sm:$0xff] }
 0x12d   : > { %2233 = vmatpush1.bf16.msra.mxu0 %v2232_v16  ;;  %2107 = vmatprep.subr.bf16.mxu1 %v2106_v4  ;;  %v607_v16 = vld [vmem:[#allocation5 + $0x9a0] sm:$0xff] }
 0x12e   : > { %2235 = vmatprep.subr.bf16.mxu0 %v2234_v8  ;;  %v411_v4 = vld [vmem:[#allocation5 + $0x380] sm:$0xff]  ;;  %v620_v8 = vld [vmem:[#allocation5 + $0xa08] sm:$0xff]  ;;  %v2128_v11 = vpack.c.bf16 %v607_v16, %v601_v3  ;;  %v2274_v3 = vpack.c.bf16 %v478_v61, %v472_v60  ;;  %v477_v16 = vld [vmem:[#allocation5 + $0x590] sm:$0xff] }
 0x12f   : > { %v2256_v12 = vpack.c.bf16 %v417_v6, %v411_v4  ;;  %v2130_v13 = vpack.c.bf16 %v620_v8, %v614_v7  ;;  %v674_v4 = vld [vmem:[#allocation5 + $0xbb8] sm:$0xff]  ;;  %v484_v6 = vld [vmem:[#allocation5 + $0x5c8] sm:$0xff] }
 0x130   : > { %2109 = vmatpush1.bf16.msra.mxu1 %v2108_v14  ;;  %v613_v14 = vld [vmem:[#allocation5 + $0x9d0] sm:$0xff]  ;;  %v490_v7 = vld [vmem:[#allocation5 + $0x5f8] sm:$0xff] }
 0x131   : > { %2237 = vmatpush1.bf16.msra.mxu0 %v2236_v15  ;;  %2111 = vmatprep.subr.bf16.mxu1 %v2110_v18  ;;  %v619_v15 = vld [vmem:[#allocation5 + $0xa00] sm:$0xff]  ;;  %v538_v60 = vld [vmem:[#allocation5 + $0x778] sm:$0xff] }
 0x132   : > { %2239 = vmatprep.subr.bf16.mxu0 %v2238_v23  ;;  %v423_v18 = vld [vmem:[#allocation5 + $0x3e0] sm:$0xff]  ;;  %v632_v23 = vld [vmem:[#allocation5 + $0xa68] sm:$0xff]  ;;  %v2132_v26 = vpack.c.bf16 %v619_v15, %v613_v14  ;;  %v2278_v14 = vpack.c.bf16 %v490_v7, %v484_v6  ;;  %v489_v15 = vld [vmem:[#allocation5 + $0x5f0] sm:$0xff] }
 0x133   : > { %v2260_v27 = vpack.c.bf16 %v429_v21, %v423_v18  ;;  %v2134_v28 = vpack.c.bf16 %v632_v23, %v626_v22  ;;  %v686_v18 = vld [vmem:[#allocation5 + $0xc18] sm:$0xff]  ;;  %v496_v21 = vld [vmem:[#allocation5 + $0x628] sm:$0xff] }
 0x134   : > { %2113 = vmatpush1.bf16.msra.mxu1 %v2112_v30  ;;  %v625_v30 = vld [vmem:[#allocation5 + $0xa30] sm:$0xff]  ;;  %v502_v22 = vld [vmem:[#allocation5 + $0x658] sm:$0xff]  ;;  %v544_v6 = vld [vmem:[#allocation5 + $0x7a8] sm:$0xff] }
 0x135   : > { %2241 = vmatpush1.bf16.msra.mxu0 %v2240_v31  ;;  %2115 = vmatprep.subr.bf16.mxu1 %v2114_v32  ;;  %v631_v31 = vld [vmem:[#allocation5 + $0xa60] sm:$0xff]  ;;  %v2537_v61 = vld [vmem:[%s3012_s29 + $0x18] sm:$0xff] }
 0x136   : > { %2243 = vmatprep.subr.bf16.mxu0 %v2242_v36  ;;  %v435_v32 = vld [vmem:[#allocation5 + $0x440] sm:$0xff]  ;;  %v644_v36 = vld [vmem:[#allocation5 + $0xac8] sm:$0xff]  ;;  %v2136_v39 = vpack.c.bf16 %v631_v31, %v625_v30  ;;  %v2282_v30 = vpack.c.bf16 %v502_v22, %v496_v21  ;;  %v501_v31 = vld [vmem:[#allocation5 + $0x650] sm:$0xff] }
 0x137   : > { %v2264_v40 = vpack.c.bf16 %v441_v34, %v435_v32  ;;  %v2138_v41 = vpack.c.bf16 %v644_v36, %v638_v35  ;;  %v698_v32 = vld [vmem:[#allocation5 + $0xc78] sm:$0xff]  ;;  %v508_v34 = vld [vmem:[#allocation5 + $0x688] sm:$0xff] }
 0x138   : > { %2117 = vmatpush1.bf16.msra.mxu1 %v2116_v42  ;;  %v637_v42 = vld [vmem:[#allocation5 + $0xa90] sm:$0xff]  ;;  %v514_v35 = vld [vmem:[#allocation5 + $0x6b8] sm:$0xff] }
 0x139   : > { %2245 = vmatpush1.bf16.msra.mxu0 %v2244_v43  ;;  %2119 = vmatprep.subr.bf16.mxu1 %v2118_v44  ;;  %v643_v43 = vld [vmem:[#allocation5 + $0xac0] sm:$0xff]  ;;  %v562_v21 = vld [vmem:[#allocation5 + $0x838] sm:$0xff] }
 0x13a   : > { %2247 = vmatprep.subr.bf16.mxu0 %v2246_v48  ;;  %v447_v44 = vld [vmem:[#allocation5 + $0x4a0] sm:$0xff]  ;;  %v656_v48 = vld [vmem:[#allocation5 + $0xb28] sm:$0xff]  ;;  %v2140_v51 = vpack.c.bf16 %v643_v43, %v637_v42  ;;  %v2286_v42 = vpack.c.bf16 %v514_v35, %v508_v34  ;;  %v513_v43 = vld [vmem:[#allocation5 + $0x6b0] sm:$0xff] }
 0x13b   : > { %v2268_v52 = vpack.c.bf16 %v453_v46, %v447_v44  ;;  %v2142_v53 = vpack.c.bf16 %v656_v48, %v650_v47  ;;  %v710_v44 = vld [vmem:[#allocation5 + $0xcd8] sm:$0xff]  ;;  %v3049_v46 = vld [vmem:[%s3012_s29 + $0x10] sm:$0xff]  ;;  %v520_v47 = vld [vmem:[#allocation5 + $0x6e8] sm:$0xff] }
 0x13c   : > { %2121 = vmatpush1.bf16.msra.mxu1 %v2120_v54  ;;  %v649_v54 = vld [vmem:[#allocation5 + $0xaf0] sm:$0xff]  ;;  %v526_v48 = vld [vmem:[#allocation5 + $0x718] sm:$0xff] }
 0x13d   : > { %2249 = vmatpush1.bf16.msra.mxu0 %v2248_v17  ;;  %2123 = vmatprep.subr.bf16.mxu1 %v2122_v55  ;;  %v655_v17 = vld [vmem:[#allocation5 + $0xb20] sm:$0xff]  ;;  %v574_v34 = vld [vmem:[#allocation5 + $0x898] sm:$0xff] }
 0x13e   : > { %2251 = vmatprep.subr.bf16.mxu0 %v2250_v59  ;;  %v459_v55 = vld [vmem:[#allocation5 + $0x500] sm:$0xff]  ;;  %v668_v59 = vld [vmem:[#allocation5 + $0xb88] sm:$0xff]  ;;  %v2144_v62 = vpack.c.bf16 %v655_v17, %v649_v54 }
 0x13f   : > { %v2272_v63 = vpack.c.bf16 %v465_v57, %v459_v55  ;;  %v2146_v0 = vpack.c.bf16 %v668_v59, %v662_v58  ;;  %v715_v54 = vld [vmem:[#allocation5 + $0xd00] sm:$0xff]  ;;  %v2290_v55 = vpack.c.bf16 %v526_v48, %v520_v47  ;;  %v722_v57 = vld [vmem:[#allocation5 + $0xd38] sm:$0xff]  ;;  %v728_v58 = vld [vmem:[#allocation5 + $0xd68] sm:$0xff] }
 0x140   : > { %2125 = vmatpush1.bf16.msra.mxu1 %v2124_v1  ;;  %v661_v1 = vld [vmem:[#allocation5 + $0xb50] sm:$0xff]  ;;  %v519_v17 = vld [vmem:[#allocation5 + $0x6e0] sm:$0xff]  ;;  %v532_v59 = vld [vmem:[#allocation5 + $0x748] sm:$0xff] }
 0x141   : > { %2253 = vmatpush1.bf16.msra.mxu0 %v2252_v2  ;;  %2127 = vmatprep.subr.bf16.mxu1 %v2126_v19  ;;  %v667_v2 = vld [vmem:[#allocation5 + $0xb80] sm:$0xff]  ;;  %v586_v47 = vld [vmem:[#allocation5 + $0x8f8] sm:$0xff] }
 0x142   : > { %2255 = vmatprep.subr.bf16.mxu0 %v2254_v5  ;;  %v471_v19 = vld [vmem:[#allocation5 + $0x560] sm:$0xff]  ;;  %v680_v5 = vld [vmem:[#allocation5 + $0xbe8] sm:$0xff]  ;;  %v2148_v8 = vpack.c.bf16 %v667_v2, %v661_v1  ;;  %v721_v1 = vld [vmem:[#allocation5 + $0xd30] sm:$0xff] }
 0x143   : > { %v2276_v9 = vpack.c.bf16 %v477_v16, %v471_v19  ;;  %v2150_v10 = vpack.c.bf16 %v680_v5, %v674_v4  ;;  %v727_v2 = vld [vmem:[#allocation5 + $0xd60] sm:$0xff]  ;;  %v537_v16 = vld [vmem:[#allocation5 + $0x770] sm:$0xff]  ;;  %v734_v4 = vld [vmem:[#allocation5 + $0xd98] sm:$0xff] }
 0x144   : > { %2129 = vmatpush1.bf16.msra.mxu1 %v2128_v11  ;;  %v673_v11 = vld [vmem:[#allocation5 + $0xbb0] sm:$0xff]  ;;  %v531_v19 = vld [vmem:[#allocation5 + $0x740] sm:$0xff]  ;;  %v740_v5 = vld [vmem:[#allocation5 + $0xdc8] sm:$0xff]  ;;  %v2168_v7 = vpack.c.bf16 %v727_v2, %v721_v1 }
 0x145   : > { %2257 = vmatpush1.bf16.msra.mxu0 %v2256_v12  ;;  %2131 = vmatprep.subr.bf16.mxu1 %v2130_v13  ;;  %v679_v12 = vld [vmem:[#allocation5 + $0xbe0] sm:$0xff]  ;;  %v597_v2 = vld [vmem:[#allocation5 + $0x950] sm:$0xff] }
 0x146   : > { %2259 = vmatprep.subr.bf16.mxu0 %v2258_v20  ;;  %v483_v13 = vld [vmem:[#allocation5 + $0x5c0] sm:$0xff]  ;;  %v692_v20 = vld [vmem:[#allocation5 + $0xc48] sm:$0xff]  ;;  %v2152_v23 = vpack.c.bf16 %v679_v12, %v673_v11 }
 0x147   : > { %v2280_v24 = vpack.c.bf16 %v489_v15, %v483_v13  ;;  %v2154_v25 = vpack.c.bf16 %v692_v20, %v686_v18  ;;  %v739_v11 = vld [vmem:[#allocation5 + $0xdc0] sm:$0xff]  ;;  %v746_v15 = vld [vmem:[#allocation5 + $0xdf8] sm:$0xff]  ;;  %v752_v18 = vld [vmem:[#allocation5 + $0xe28] sm:$0xff] }
 0x148   : > { %2133 = vmatpush1.bf16.msra.mxu1 %v2132_v26  ;;  %v685_v26 = vld [vmem:[#allocation5 + $0xc10] sm:$0xff]  ;;  %v543_v12 = vld [vmem:[#allocation5 + $0x7a0] sm:$0xff]  ;;  %v556_v20 = vld [vmem:[#allocation5 + $0x808] sm:$0xff] }
 0x149   : > { %2261 = vmatpush1.bf16.msra.mxu0 %v2260_v27  ;;  %2135 = vmatprep.subr.bf16.mxu1 %v2134_v28  ;;  %v691_v27 = vld [vmem:[#allocation5 + $0xc40] sm:$0xff] }
 0x14a   : > { %2263 = vmatprep.subr.bf16.mxu0 %v2262_v33  ;;  %v495_v28 = vld [vmem:[#allocation5 + $0x620] sm:$0xff]  ;;  %v704_v33 = vld [vmem:[#allocation5 + $0xca8] sm:$0xff]  ;;  %v2156_v36 = vpack.c.bf16 %v691_v27, %v685_v26 }
 0x14b   : > { %v2284_v37 = vpack.c.bf16 %v501_v31, %v495_v28  ;;  %v2158_v38 = vpack.c.bf16 %v704_v33, %v698_v32  ;;  %v751_v26 = vld [vmem:[#allocation5 + $0xe20] sm:$0xff]  ;;  %v2302_v28 = vpack.c.bf16 %v562_v21, %v556_v20  ;;  %v758_v31 = vld [vmem:[#allocation5 + $0xe58] sm:$0xff]  ;;  %v764_v32 = vld [vmem:[#allocation5 + $0xe88] sm:$0xff] }
 0x14c   : > { %2137 = vmatpush1.bf16.msra.mxu1 %v2136_v39  ;;  %v697_v39 = vld [vmem:[#allocation5 + $0xc70] sm:$0xff]  ;;  %v555_v27 = vld [vmem:[#allocation5 + $0x800] sm:$0xff]  ;;  %v568_v33 = vld [vmem:[#allocation5 + $0x868] sm:$0xff] }
 0x14d   : > { %2265 = vmatpush1.bf16.msra.mxu0 %v2264_v40  ;;  %2139 = vmatprep.subr.bf16.mxu1 %v2138_v41  ;;  %v703_v40 = vld [vmem:[#allocation5 + $0xca0] sm:$0xff] }
 0x14e   : > { %2267 = vmatprep.subr.bf16.mxu0 %v2266_v45  ;;  %v507_v41 = vld [vmem:[#allocation5 + $0x680] sm:$0xff]  ;;  %v716_v45 = vld [vmem:[#allocation5 + $0xd08] sm:$0xff]  ;;  %v2160_v50 = vpack.c.bf16 %v703_v40, %v697_v39 }
 0x14f   : > { %v763_v39 = vld [vmem:[#allocation5 + $0xe80] sm:$0xff] }
 0x150   : > { %2141 = vmatpush1.bf16.msra.mxu1 %v2140_v51  ;;  %v2288_v51 = vpack.c.bf16 %v513_v43, %v507_v41  ;;  %v567_v40 = vld [vmem:[#allocation5 + $0x860] sm:$0xff]  ;;  %v2306_v41 = vpack.c.bf16 %v574_v34, %v568_v33  ;;  %v770_v43 = vld [vmem:[#allocation5 + $0xeb8] sm:$0xff] }
 0x151   : > { %2269 = vmatpush1.bf16.msra.mxu0 %v2268_v52  ;;  %2143 = vmatprep.subr.bf16.mxu1 %v2142_v53  ;;  %v2162_v52 = vpack.c.bf16 %v716_v45, %v710_v44  ;;  %v709_v53 = vld [vmem:[#allocation5 + $0xcd0] sm:$0xff]  ;;  %v776_v44 = vld [vmem:[#allocation5 + $0xee8] sm:$0xff] }
 0x152   : > { %2271 = vmatprep.subr.bf16.mxu0 %v2270_v56  ;;  %v525_v56 = vld [vmem:[#allocation5 + $0x710] sm:$0xff]  ;;  %v580_v45 = vld [vmem:[#allocation5 + $0x8c8] sm:$0xff] }
 0x154   : > { %2145 = vmatpush1.bf16.msra.mxu1 %v2144_v62  ;;  %v2164_v62 = vpack.c.bf16 %v715_v54, %v709_v53  ;;  %v579_v53 = vld [vmem:[#allocation5 + $0x8c0] sm:$0xff]  ;;  %v2310_v54 = vpack.c.bf16 %v586_v47, %v580_v45 }
 0x155   : > { %2273 = vmatpush1.bf16.msra.mxu0 %v2272_v63  ;;  %2147 = vmatprep.subr.bf16.mxu1 %v2146_v0  ;;  %v2292_v63 = vpack.c.bf16 %v525_v56, %v519_v17  ;;  %v2166_v0 = vpack.c.bf16 %v728_v58, %v722_v57  ;;  %v585_v17 = vld [vmem:[#allocation5 + $0x8f0] sm:$0xff]  ;;  %v788_v56 = vld [vmem:[#allocation5 + $0xf48] sm:$0xff]  ;;  %v598_v58 = vld [vmem:[#allocation5 + $0x958] sm:$0xff] }
 0x156   : > { %2275 = vmatprep.subr.bf16.mxu0 %v2274_v3  ;;  %v2294_v3 = vpack.c.bf16 %v538_v60, %v532_v59  ;;  %v592_v57 = vld [vmem:[#allocation5 + $0x928] sm:$0xff]  ;;  %v2312_v60 = vpack.c.bf16 %v585_v17, %v579_v53  ;;  %v842_v53 = vld [vmem:[#allocation5 + $0x10f8] sm:$0xff] }
 0x157   : > { %v2314_v1 = vpack.c.bf16 %v598_v58, %v592_v57  ;;  %v652_v17 = vld [vmem:[#allocation5 + $0xb08] sm:$0xff] }
 0x158   : > { %2149 = vmatpush1.bf16.msra.mxu1 %v2148_v8  ;;  %v2296_v8 = vpack.c.bf16 %v537_v16, %v531_v19  ;;  %v794_v19 = vld [vmem:[#allocation5 + $0xf78] sm:$0xff]  ;;  %v604_v16 = vld [vmem:[#allocation5 + $0x988] sm:$0xff] }
 0x159   : > { %2277 = vmatpush1.bf16.msra.mxu0 %v2276_v9  ;;  %2151 = vmatprep.subr.bf16.mxu1 %v2150_v10  ;;  %v2170_v9 = vpack.c.bf16 %v740_v5, %v734_v4  ;;  %v733_v10 = vld [vmem:[#allocation5 + $0xd90] sm:$0xff]  ;;  %v610_v4 = vld [vmem:[#allocation5 + $0x9b8] sm:$0xff] }
 0x15a   : > { %2279 = vmatprep.subr.bf16.mxu0 %v2278_v14  ;;  %v549_v14 = vld [vmem:[#allocation5 + $0x7d0] sm:$0xff]  ;;  %v2172_v22 = vpack.c.bf16 %v739_v11, %v733_v10  ;;  %v2318_v10 = vpack.c.bf16 %v610_v4, %v604_v16 }
 0x15b   : > { %v609_v11 = vld [vmem:[#allocation5 + $0x9b0] sm:$0xff] }
 0x15c   : > { %2153 = vmatpush1.bf16.msra.mxu1 %v2152_v23  ;;  %v2300_v23 = vpack.c.bf16 %v549_v14, %v543_v12  ;;  %v806_v12 = vld [vmem:[#allocation5 + $0xfd8] sm:$0xff]  ;;  %v616_v14 = vld [vmem:[#allocation5 + $0x9e8] sm:$0xff] }
 0x15d   : > { %2281 = vmatpush1.bf16.msra.mxu0 %v2280_v24  ;;  %2155 = vmatprep.subr.bf16.mxu1 %v2154_v25  ;;  %v2174_v24 = vpack.c.bf16 %v752_v18, %v746_v15  ;;  %v745_v25 = vld [vmem:[#allocation5 + $0xdf0] sm:$0xff]  ;;  %v622_v15 = vld [vmem:[#allocation5 + $0xa18] sm:$0xff] }
 0x15e   : > { %2283 = vmatprep.subr.bf16.mxu0 %v2282_v30  ;;  %v561_v30 = vld [vmem:[#allocation5 + $0x830] sm:$0xff]  ;;  %v2176_v35 = vpack.c.bf16 %v751_v26, %v745_v25  ;;  %v2322_v25 = vpack.c.bf16 %v622_v15, %v616_v14 }
 0x15f   : > { %1256 = vmatmul.mubr.f32.vlgmr.msra.gmra.mrb[2].mxu1 %v3049_v46  ;;  %v621_v26 = vld [vmem:[#allocation5 + $0xa10] sm:$0xff] }
 0x160   : > { %2157 = vmatpush1.bf16.msra.mxu1 %v2156_v36  ;;  %1398 = vmatmul.mubr.f32.vlgmr.msra.gmra.mrb[2].mxu0 %v2536_v49  ;;  %v2304_v36 = vpack.c.bf16 %v561_v30, %v555_v27  ;;  %v818_v27 = vld [vmem:[#allocation5 + $0x1038] sm:$0xff]  ;;  %v628_v30 = vld [vmem:[#allocation5 + $0xa48] sm:$0xff] }
 0x161   : > { %2285 = vmatpush1.bf16.msra.mxu0 %v2284_v37  ;;  %2159 = vmatprep.subr.bf16.mxu1 %v2158_v38  ;;  %v2178_v37 = vpack.c.bf16 %v764_v32, %v758_v31  ;;  %v757_v38 = vld [vmem:[#allocation5 + $0xe50] sm:$0xff]  ;;  %v634_v31 = vld [vmem:[#allocation5 + $0xa78] sm:$0xff] }
 0x162   : > { %2287 = vmatprep.subr.bf16.mxu0 %v2286_v42  ;;  %1326 = vmatprep.mubr.f32.mxu1 %v3041_v29  ;;  %v550_v29 = vld [vmem:[#allocation5 + $0x7d8] sm:$0xff]  ;;  %v573_v42 = vld [vmem:[#allocation5 + $0x890] sm:$0xff]  ;;  %v2180_v48 = vpack.c.bf16 %v763_v39, %v757_v38  ;;  %v2326_v38 = vpack.c.bf16 %v634_v31, %v628_v30  ;;  %v687_v30 = vld [vmem:[#allocation5 + $0xc20] sm:$0xff] }
 0x163   : > { %1468 = vmatprep.mubr.f32.mxu0 %v2537_v61  ;;  %v2298_v13 = vpack.c.bf16 %v550_v29, %v544_v6  ;;  %v2308_v49 = vpack.c.bf16 %v573_v42, %v567_v40  ;;  %v633_v39 = vld [vmem:[#allocation5 + $0xa70] sm:$0xff]  ;;  %v830_v40 = vld [vmem:[#allocation5 + $0x1098] sm:$0xff]  ;;  %v640_v42 = vld [vmem:[#allocation5 + $0xaa8] sm:$0xff] }
 0x164   : > { %2161 = vmatpush1.bf16.msra.mxu1 %v2160_v50  ;;  %v2182_v50 = vpack.c.bf16 %v776_v44, %v770_v43  ;;  %v646_v43 = vld [vmem:[#allocation5 + $0xad8] sm:$0xff]  ;;  %v693_v31 = vld [vmem:[#allocation5 + $0xc50] sm:$0xff] }
 0x165   : > { %2289 = vmatpush1.bf16.msra.mxu0 %v2288_v51  ;;  %2163 = vmatprep.subr.bf16.mxu1 %v2162_v52  ;;  %v769_v51 = vld [vmem:[#allocation5 + $0xeb0] sm:$0xff]  ;;  %v775_v52 = vld [vmem:[#allocation5 + $0xee0] sm:$0xff] }
 0x166   : > { %2291 = vmatprep.subr.bf16.mxu0 %v2290_v55  ;;  %v782_v55 = vld [vmem:[#allocation5 + $0xf18] sm:$0xff]  ;;  %v2184_v59 = vpack.c.bf16 %v775_v52, %v769_v51  ;;  %v2330_v51 = vpack.c.bf16 %v646_v43, %v640_v42  ;;  %v645_v52 = vld [vmem:[#allocation5 + $0xad0] sm:$0xff] }
 0x167   : > { %v2186_v61 = vpack.c.bf16 %v788_v56, %v782_v55  ;;  %v658_v55 = vld [vmem:[#allocation5 + $0xb38] sm:$0xff] }
 0x168   : > { %2165 = vmatpush1.bf16.msra.mxu1 %v2164_v62  ;;  %v781_v62 = vld [vmem:[#allocation5 + $0xf10] sm:$0xff]  ;;  %v2539_v42 = vld [vmem:[%s3012_s29 + $0x28] sm:$0xff] }
 0x169   : > { %2293 = vmatpush1.bf16.msra.mxu0 %v2292_v63  ;;  %2167 = vmatprep.subr.bf16.mxu1 %v2166_v0  ;;  %v787_v63 = vld [vmem:[#allocation5 + $0xf40] sm:$0xff] }
 0x16a   : > { %2295 = vmatprep.subr.bf16.mxu0 %v2294_v3  ;;  %v591_v0 = vld [vmem:[#allocation5 + $0x920] sm:$0xff]  ;;  %v800_v3 = vld [vmem:[#allocation5 + $0xfa8] sm:$0xff]  ;;  %v2188_v5 = vpack.c.bf16 %v787_v63, %v781_v62  ;;  %v2334_v62 = vpack.c.bf16 %v658_v55, %v652_v17  ;;  %v657_v63 = vld [vmem:[#allocation5 + $0xb30] sm:$0xff] }
 0x16b   : > { %v2316_v6 = vpack.c.bf16 %v597_v2, %v591_v0  ;;  %v2190_v29 = vpack.c.bf16 %v800_v3, %v794_v19  ;;  %v854_v0 = vld [vmem:[#allocation5 + $0x1158] sm:$0xff]  ;;  %v664_v2 = vld [vmem:[#allocation5 + $0xb68] sm:$0xff]  ;;  %v735_v55 = vld [vmem:[#allocation5 + $0xda0] sm:$0xff] }
 0x16c   : > { %2169 = vmatpush1.bf16.msra.mxu1 %v2168_v7  ;;  %v793_v7 = vld [vmem:[#allocation5 + $0xf70] sm:$0xff]  ;;  %v670_v19 = vld [vmem:[#allocation5 + $0xb98] sm:$0xff] }
 0x16d   : > { %2297 = vmatpush1.bf16.msra.mxu0 %v2296_v8  ;;  %2171 = vmatprep.subr.bf16.mxu1 %v2170_v9  ;;  %v799_v8 = vld [vmem:[#allocation5 + $0xfa0] sm:$0xff] }
 0x16e   : > { %2299 = vmatprep.subr.bf16.mxu0 %v2298_v13  ;;  %v603_v9 = vld [vmem:[#allocation5 + $0x980] sm:$0xff]  ;;  %v812_v13 = vld [vmem:[#allocation5 + $0x1008] sm:$0xff]  ;;  %v2192_v18 = vpack.c.bf16 %v799_v8, %v793_v7  ;;  %v2338_v7 = vpack.c.bf16 %v670_v19, %v664_v2  ;;  %v669_v8 = vld [vmem:[#allocation5 + $0xb90] sm:$0xff] }
 0x16f   : > { %v2320_v20 = vpack.c.bf16 %v609_v11, %v603_v9  ;;  %v2194_v21 = vpack.c.bf16 %v812_v13, %v806_v12  ;;  %v866_v9 = vld [vmem:[#allocation5 + $0x11b8] sm:$0xff]  ;;  %v676_v11 = vld [vmem:[#allocation5 + $0xbc8] sm:$0xff]  ;;  %v759_v19 = vld [vmem:[#allocation5 + $0xe60] sm:$0xff] }
 0x170   : > { %2173 = vmatpush1.bf16.msra.mxu1 %v2172_v22  ;;  %v805_v22 = vld [vmem:[#allocation5 + $0xfd0] sm:$0xff]  ;;  %v682_v12 = vld [vmem:[#allocation5 + $0xbf8] sm:$0xff] }
 0x171   : > { %2301 = vmatpush1.bf16.msra.mxu0 %v2300_v23  ;;  %2175 = vmatprep.subr.bf16.mxu1 %v2174_v24  ;;  %v811_v23 = vld [vmem:[#allocation5 + $0x1000] sm:$0xff] }
 0x172   : > { %2303 = vmatprep.subr.bf16.mxu0 %v2302_v28  ;;  %v615_v24 = vld [vmem:[#allocation5 + $0x9e0] sm:$0xff]  ;;  %v824_v28 = vld [vmem:[#allocation5 + $0x1068] sm:$0xff]  ;;  %v2196_v32 = vpack.c.bf16 %v811_v23, %v805_v22  ;;  %v681_v23 = vld [vmem:[#allocation5 + $0xbf0] sm:$0xff] }
 0x173   : > { %v2324_v33 = vpack.c.bf16 %v621_v26, %v615_v24  ;;  %v2198_v34 = vpack.c.bf16 %v824_v28, %v818_v27  ;;  %v675_v22 = vld [vmem:[#allocation5 + $0xbc0] sm:$0xff]  ;;  %v688_v24 = vld [vmem:[#allocation5 + $0xc28] sm:$0xff] }
 0x174   : > { %2177 = vmatpush1.bf16.msra.mxu1 %v2176_v35  ;;  %v817_v35 = vld [vmem:[#allocation5 + $0x1030] sm:$0xff]  ;;  %v2344_v27 = vpack.c.bf16 %v681_v23, %v675_v22  ;;  %v795_v23 = vld [vmem:[#allocation5 + $0xf80] sm:$0xff] }
 0x175   : > { %2305 = vmatpush1.bf16.msra.mxu0 %v2304_v36  ;;  %2179 = vmatprep.subr.bf16.mxu1 %v2178_v37  ;;  %v823_v36 = vld [vmem:[#allocation5 + $0x1060] sm:$0xff] }
 0x176   : > { %2307 = vmatprep.subr.bf16.mxu0 %v2306_v41  ;;  %v627_v37 = vld [vmem:[#allocation5 + $0xa40] sm:$0xff]  ;;  %v836_v41 = vld [vmem:[#allocation5 + $0x10c8] sm:$0xff]  ;;  %v2200_v44 = vpack.c.bf16 %v823_v36, %v817_v35 }
 0x177   : > { %v2328_v45 = vpack.c.bf16 %v633_v39, %v627_v37  ;;  %v2202_v47 = vpack.c.bf16 %v836_v41, %v830_v40  ;;  %v699_v36 = vld [vmem:[#allocation5 + $0xc80] sm:$0xff]  ;;  %v705_v37 = vld [vmem:[#allocation5 + $0xcb0] sm:$0xff]  ;;  %v712_v39 = vld [vmem:[#allocation5 + $0xce8] sm:$0xff] }
 0x178   : > { %2181 = vmatpush1.bf16.msra.mxu1 %v2180_v48  ;;  %v829_v48 = vld [vmem:[#allocation5 + $0x1090] sm:$0xff]  ;;  %v718_v40 = vld [vmem:[#allocation5 + $0xd18] sm:$0xff]  ;;  %v2352_v41 = vpack.c.bf16 %v705_v37, %v699_v36  ;;  %v819_v36 = vld [vmem:[#allocation5 + $0x1040] sm:$0xff] }
 0x179   : > { %2309 = vmatpush1.bf16.msra.mxu0 %v2308_v49  ;;  %2183 = vmatprep.subr.bf16.mxu1 %v2182_v50  ;;  %v835_v49 = vld [vmem:[#allocation5 + $0x10c0] sm:$0xff]  ;;  %v2354_v43 = vpack.c.bf16 %v718_v40, %v712_v39  ;;  %v825_v37 = vld [vmem:[#allocation5 + $0x1070] sm:$0xff]  ;;  %v832_v39 = vld [vmem:[#allocation5 + $0x10a8] sm:$0xff] }
 0x17a   : > { %2311 = vmatprep.subr.bf16.mxu0 %v2310_v54  ;;  %v639_v50 = vld [vmem:[#allocation5 + $0xaa0] sm:$0xff]  ;;  %v848_v54 = vld [vmem:[#allocation5 + $0x1128] sm:$0xff]  ;;  %v2204_v56 = vpack.c.bf16 %v835_v49, %v829_v48  ;;  %v730_v48 = vld [vmem:[#allocation5 + $0xd78] sm:$0xff] }
 0x17b   : > { %v2332_v57 = vpack.c.bf16 %v645_v52, %v639_v50  ;;  %v2206_v58 = vpack.c.bf16 %v848_v54, %v842_v53  ;;  %v729_v52 = vld [vmem:[#allocation5 + $0xd70] sm:$0xff]  ;;  %v736_v53 = vld [vmem:[#allocation5 + $0xda8] sm:$0xff]  ;;  %v742_v54 = vld [vmem:[#allocation5 + $0xdd8] sm:$0xff] }
 0x17c   : > { %2185 = vmatpush1.bf16.msra.mxu1 %v2184_v59  ;;  %v841_v59 = vld [vmem:[#allocation5 + $0x10f0] sm:$0xff]  ;;  %v2362_v17 = vpack.c.bf16 %v742_v54, %v736_v53  ;;  %v838_v40 = vld [vmem:[#allocation5 + $0x10d8] sm:$0xff] }
 0x17d   : > { %2313 = vmatpush1.bf16.msra.mxu0 %v2312_v60  ;;  %2187 = vmatprep.subr.bf16.mxu1 %v2186_v61  ;;  %v847_v60 = vld [vmem:[#allocation5 + $0x1120] sm:$0xff]  ;;  %v862_v53 = vld [vmem:[#allocation5 + $0x1198] sm:$0xff] }
 0x17e   : > { %2315 = vmatprep.subr.bf16.mxu0 %v2314_v1  ;;  %v651_v61 = vld [vmem:[#allocation5 + $0xb00] sm:$0xff]  ;;  %v860_v1 = vld [vmem:[#allocation5 + $0x1188] sm:$0xff]  ;;  %v2208_v3 = vpack.c.bf16 %v847_v60, %v841_v59 }
 0x17f   : > { %v2336_v16 = vpack.c.bf16 %v657_v63, %v651_v61  ;;  %v2210_v4 = vpack.c.bf16 %v860_v1, %v854_v0  ;;  %v747_v61 = vld [vmem:[#allocation5 + $0xe00] sm:$0xff]  ;;  %v760_v63 = vld [vmem:[#allocation5 + $0xe68] sm:$0xff]  ;;  %v766_v0 = vld [vmem:[#allocation5 + $0xe98] sm:$0xff] }
 0x180   : > { %2189 = vmatpush1.bf16.msra.mxu1 %v2188_v5  ;;  %v853_v5 = vld [vmem:[#allocation5 + $0x1150] sm:$0xff]  ;;  %v2370_v2 = vpack.c.bf16 %v766_v0, %v760_v63  ;;  %v877_v63 = vlaneseq }
 0x181   : > { %2317 = vmatpush1.bf16.msra.mxu0 %v2316_v6  ;;  %2191 = vmatprep.subr.bf16.mxu1 %v2190_v29  ;;  %v859_v6 = vld [vmem:[#allocation5 + $0x1180] sm:$0xff] }
 0x182   : > { %2319 = vmatprep.subr.bf16.mxu0 %v2318_v10  ;;  %v663_v29 = vld [vmem:[#allocation5 + $0xb60] sm:$0xff]  ;;  %v872_v10 = vld [vmem:[#allocation5 + $0x11e8] sm:$0xff]  ;;  %v2212_v13 = vpack.c.bf16 %v859_v6, %v853_v5  ;;  %v778_v5 = vld [vmem:[#allocation5 + $0xef8] sm:$0xff]  ;;  %v878_v0 = vshrl.u32 %v877_v63, 7 }
 0x183   : > { %v2340_v14 = vpack.c.bf16 %v669_v8, %v663_v29  ;;  %v2214_v15 = vpack.c.bf16 %v872_v10, %v866_v9  ;;  %v771_v8 = vld [vmem:[#allocation5 + $0xec0] sm:$0xff]  ;;  %v777_v9 = vld [vmem:[#allocation5 + $0xef0] sm:$0xff]  ;;  %v784_v10 = vld [vmem:[#allocation5 + $0xf28] sm:$0xff] }
 0x184   : > { %2193 = vmatpush1.bf16.msra.mxu1 %v2192_v18  ;;  %v865_v18 = vld [vmem:[#allocation5 + $0x11b0] sm:$0xff] }
 0x185   : > { %2321 = vmatpush1.bf16.msra.mxu0 %v2320_v20  ;;  %2195 = vmatprep.subr.bf16.mxu1 %v2194_v21  ;;  %v871_v20 = vld [vmem:[#allocation5 + $0x11e0] sm:$0xff]  ;;  %v2342_v21 = vpack.c.bf16 %v682_v12, %v676_v11  ;;  %v790_v11 = vld [vmem:[#allocation5 + $0xf58] sm:$0xff]  ;;  %v2376_v12 = vpack.c.bf16 %v777_v9, %v771_v8 }
 0x186   : > { %2323 = vmatprep.subr.bf16.mxu0 %v2322_v25  ;;  %v694_v25 = vld [vmem:[#allocation5 + $0xc58] sm:$0xff]  ;;  %v2216_v26 = vpack.c.bf16 %v871_v20, %v865_v18  ;;  %v796_v18 = vld [vmem:[#allocation5 + $0xf88] sm:$0xff] }
 0x187   : > { %v2346_v28 = vpack.c.bf16 %v694_v25, %v688_v24  ;;  %v802_v20 = vld [vmem:[#allocation5 + $0xfb8] sm:$0xff]  ;;  %v801_v24 = vld [vmem:[#allocation5 + $0xfb0] sm:$0xff]  ;;  %v808_v25 = vld [vmem:[#allocation5 + $0xfe8] sm:$0xff] }
 0x188   : > { %2197 = vmatpush1.bf16.msra.mxu1 %v2196_v32  ;;  %v700_v32 = vld [vmem:[#allocation5 + $0xc88] sm:$0xff]  ;;  %v2382_v22 = vpack.c.bf16 %v802_v20, %v796_v18 }
 0x189   : > { %2325 = vmatpush1.bf16.msra.mxu0 %v2324_v33  ;;  %2199 = vmatprep.subr.bf16.mxu1 %v2198_v34  ;;  %v706_v33 = vld [vmem:[#allocation5 + $0xcb8] sm:$0xff]  ;;  %v2348_v34 = vpack.c.bf16 %v693_v31, %v687_v30  ;;  %v807_v30 = vld [vmem:[#allocation5 + $0xfe0] sm:$0xff]  ;;  %v813_v31 = vld [vmem:[#allocation5 + $0x1010] sm:$0xff] }
 0x18a   : > { %2327 = vmatprep.subr.bf16.mxu0 %v2326_v38  ;;  %v2350_v35 = vpack.c.bf16 %v706_v33, %v700_v32  ;;  %v3056_v38 = vld [vmem:[%s3012_s29 + $0x20] sm:$0xff]  ;;  %v820_v32 = vld [vmem:[#allocation5 + $0x1048] sm:$0xff]  ;;  %v826_v33 = vld [vmem:[#allocation5 + $0x1078] sm:$0xff] }
 0x18c   : > { %2201 = vmatpush1.bf16.msra.mxu1 %v2200_v44  ;;  %v711_v44 = vld [vmem:[#allocation5 + $0xce0] sm:$0xff] }
 0x18d   : > { %2329 = vmatpush1.bf16.msra.mxu0 %v2328_v45  ;;  %2203 = vmatprep.subr.bf16.mxu1 %v2202_v47  ;;  %v717_v45 = vld [vmem:[#allocation5 + $0xd10] sm:$0xff]  ;;  %v724_v47 = vld [vmem:[#allocation5 + $0xd48] sm:$0xff] }
 0x18e   : > { %2331 = vmatprep.subr.bf16.mxu0 %v2330_v51  ;;  %v2356_v49 = vpack.c.bf16 %v717_v45, %v711_v44  ;;  %v2358_v50 = vpack.c.bf16 %v730_v48, %v724_v47  ;;  %v723_v51 = vld [vmem:[#allocation5 + $0xd40] sm:$0xff]  ;;  %v837_v44 = vld [vmem:[#allocation5 + $0x10d0] sm:$0xff]  ;;  %v844_v45 = vld [vmem:[#allocation5 + $0x1108] sm:$0xff] }
 0x18f   : > { %v850_v47 = vld [vmem:[#allocation5 + $0x1138] sm:$0xff] }
 0x190   : > { %2205 = vmatpush1.bf16.msra.mxu1 %v2204_v56  ;;  %v741_v56 = vld [vmem:[#allocation5 + $0xdd0] sm:$0xff] }
 0x191   : > { %2333 = vmatpush1.bf16.msra.mxu0 %v2332_v57  ;;  %2207 = vmatprep.subr.bf16.mxu1 %v2206_v58  ;;  %v748_v57 = vld [vmem:[#allocation5 + $0xe08] sm:$0xff]  ;;  %v754_v58 = vld [vmem:[#allocation5 + $0xe38] sm:$0xff]  ;;  %v2364_v59 = vpack.c.bf16 %v741_v56, %v735_v55  ;;  %v861_v55 = vld [vmem:[#allocation5 + $0x1190] sm:$0xff] }
 0x192   : > { %2335 = vmatprep.subr.bf16.mxu0 %v2334_v62  ;;  %v2366_v60 = vpack.c.bf16 %v754_v58, %v748_v57  ;;  %v753_v62 = vld [vmem:[#allocation5 + $0xe30] sm:$0xff]  ;;  %v868_v56 = vld [vmem:[#allocation5 + $0x11c8] sm:$0xff]  ;;  %v874_v57 = vld [vmem:[#allocation5 + $0x11f8] sm:$0xff] }
 0x193   : > { %v2368_v1 = vpack.c.bf16 %v753_v62, %v747_v61  ;;  %v873_v61 = vld [vmem:[#allocation5 + $0x11f0] sm:$0xff] }
 0x194   : > { %2209 = vmatpush1.bf16.msra.mxu1 %v2208_v3  ;;  %v765_v3 = vld [vmem:[#allocation5 + $0xe90] sm:$0xff] }
 0x195   : > { %2337 = vmatpush1.bf16.msra.mxu0 %v2336_v16  ;;  %2211 = vmatprep.subr.bf16.mxu1 %v2210_v4  ;;  %v772_v4 = vld [vmem:[#allocation5 + $0xec8] sm:$0xff]  ;;  %v2372_v29 = vpack.c.bf16 %v765_v3, %v759_v19  ;;  %v3068_v19 = vsub.s32 1, %v878_v0 }
 0x196   : > { %2339 = vmatprep.subr.bf16.mxu0 %v2338_v7  ;;  %v2374_v7 = vpack.c.bf16 %v778_v5, %v772_v4 }
 0x198   : > { %2213 = vmatpush1.bf16.msra.mxu1 %v2212_v13  ;;  %v2378_v13 = vpack.c.bf16 %v790_v11, %v784_v10 }
 0x199   : > { %2341 = vmatpush1.bf16.msra.mxu0 %v2340_v14  ;;  %2215 = vmatprep.subr.bf16.mxu1 %v2214_v15  ;;  %v783_v14 = vld [vmem:[#allocation5 + $0xf20] sm:$0xff]  ;;  %v789_v15 = vld [vmem:[#allocation5 + $0xf50] sm:$0xff] }
 0x19a   : > { %2343 = vmatprep.subr.bf16.mxu0 %v2342_v21  ;;  %v2380_v21 = vpack.c.bf16 %v789_v15, %v783_v14  ;;  %v3077_v14 = vsub.s32 3, %v878_v0 }
 0x19c   : > { %2217 = vmatpush1.bf16.msra.mxu1 %v2216_v26  ;;  %v814_v26 = vld [vmem:[#allocation5 + $0x1018] sm:$0xff] }
 0x19d   : > { %2345 = vmatpush1.bf16.msra.mxu0 %v2344_v27  ;;  %v2384_v27 = vpack.c.bf16 %v801_v24, %v795_v23  ;;  %v3080_v23 = vsub.s32 4, %v878_v0  ;;  %v3082_v24 = vsub.s32 5, %v878_v0 }
 0x19e   : > { %2347 = vmatprep.subr.bf16.mxu0 %v2346_v28  ;;  %v2386_v28 = vpack.c.bf16 %v814_v26, %v808_v25 }
 0x19f   : > { %1327 = vmatmul.mubr.f32.vlgmr.msra.gmra.mrb[2].mxu1 %v3056_v38 }
 0x1a0   : > { %1469 = vmatmul.mubr.f32.vlgmr.msra.gmra.mrb[2].mxu0 %v3049_v46  ;;  %v2360_v46 = vpack.c.bf16 %v729_v52, %v723_v51  ;;  %v849_v51 = vld [vmem:[#allocation5 + $0x1130] sm:$0xff]  ;;  %v856_v52 = vld [vmem:[#allocation5 + $0x1168] sm:$0xff] }
 0x1a1   : > { %2349 = vmatpush1.bf16.msra.mxu0 %v2348_v34  ;;  %1539 = vmatprep.mubr.f32.mxu0 %v2539_v42  ;;  %v2388_v34 = vpack.c.bf16 %v813_v31, %v807_v30  ;;  %v2394_v42 = vpack.c.bf16 %v838_v40, %v832_v39 }
 0x1a2   : > { %2351 = vmatprep.subr.bf16.mxu0 %v2350_v35  ;;  %v2390_v35 = vpack.c.bf16 %v826_v33, %v820_v32 }
 0x1a5   : > { %2353 = vmatpush1.bf16.msra.mxu0 %v2352_v41  ;;  %v2392_v41 = vpack.c.bf16 %v825_v37, %v819_v36 }
 0x1a6   : > { %2355 = vmatprep.subr.bf16.mxu0 %v2354_v43  ;;  %v831_v43 = vld [vmem:[#allocation5 + $0x10a0] sm:$0xff] }
 0x1a7   : > { %v2396_v48 = vpack.c.bf16 %v837_v44, %v831_v43 }
 0x1a9   : > { %2357 = vmatpush1.bf16.msra.mxu0 %v2356_v49  ;;  %v2398_v49 = vpack.c.bf16 %v850_v47, %v844_v45 }
 0x1aa   : > { %2359 = vmatprep.subr.bf16.mxu0 %v2358_v50  ;;  %v843_v50 = vld [vmem:[#allocation5 + $0x1100] sm:$0xff] }
 0x1ab   : > { %v2400_v54 = vpack.c.bf16 %v849_v51, %v843_v50 }
 0x1ad   : > { %2361 = vmatpush1.bf16.msra.mxu0 %v2360_v46  ;;  %v2402_v46 = vpack.c.bf16 %v862_v53, %v856_v52 }
 0x1ae   : > { %2363 = vmatprep.subr.bf16.mxu0 %v2362_v17  ;;  %v855_v17 = vld [vmem:[#allocation5 + $0x1160] sm:$0xff] }
 0x1af   : > { %v2404_v58 = vpack.c.bf16 %v861_v55, %v855_v17 }
 0x1b1   : > { %2365 = vmatpush1.bf16.msra.mxu0 %v2364_v59  ;;  %v2406_v59 = vpack.c.bf16 %v874_v57, %v868_v56 }
 0x1b2   : > { %2367 = vmatprep.subr.bf16.mxu0 %v2366_v60  ;;  %v3061_v16 = vpop.f32.mrb[0].mxu1  ;;  %v867_v60 = vld [vmem:[#allocation5 + $0x11c0] sm:$0xff] }
 0x1b3   : > { %v3063_v6 = vpop.f32.mrb[1].mxu1  ;;  %v2408_v62 = vpack.c.bf16 %v873_v61, %v867_v60 }
 0x1b5   : > { %2369 = vmatpush1.bf16.msra.mxu0 %v2368_v1  ;;  %v3066_v1 = vsub.s32 0, %v878_v0 }
 0x1b6   : > { %2371 = vmatprep.subr.bf16.mxu0 %v2370_v2  ;;  %v875_v2 = vld [vmem:[#allocation7] sm:$0x3f] }
 0x1b7   : > { %v880_v3 = vrot.slane %v875_v2, %v3066_v1  ;;  %v884_v4 = vrot.slane %v875_v2, %v3068_v19  ;;  %v892_v18 = vrot.slane %v875_v2, %v3077_v14  ;;  %v896_v25 = vrot.slane %v875_v2, %v3080_v23 }
 0x1b8   : > { %v900_v26 = vrot.slane %v875_v2, %v3082_v24 }
 0x1b9   : > { %2373 = vmatpush1.bf16.msra.mxu0 %v2372_v29  ;;  %v974_v5 = vadd.f32 %v3061_v16, %v880_v3  ;;  %v976_v29 = vadd.f32 %v3063_v6, %v884_v4 }
 0x1ba   : > { %2375 = vmatprep.subr.bf16.mxu0 %v2374_v7 }
 0x1bd   : > { %2377 = vmatpush1.bf16.msra.mxu0 %v2376_v12  ;;  %v3074_v12 = vsub.s32 2, %v878_v0 }
 0x1be   : > { %2379 = vmatprep.subr.bf16.mxu0 %v2378_v13 }
 0x1bf   : > { %v888_v13 = vrot.slane %v875_v2, %v3074_v12 }
 0x1c1   : > { %2381 = vmatpush1.bf16.msra.mxu0 %v2380_v21 }
 0x1c2   : > { %2383 = vmatprep.subr.bf16.mxu0 %v2382_v22 }
 0x1c5   : > { %2385 = vmatpush1.bf16.msra.mxu0 %v2384_v27 }
 0x1c6   : > { %2387 = vmatprep.subr.bf16.mxu0 %v2386_v28 }
 0x1c9   : > { %2389 = vmatpush1.bf16.msra.mxu0 %v2388_v34 }
 0x1ca   : > { %2391 = vmatprep.subr.bf16.mxu0 %v2390_v35 }
 0x1cd   : > { %2393 = vmatpush1.bf16.msra.mxu0 %v2392_v41 }
 0x1ce   : > { %2395 = vmatprep.subr.bf16.mxu0 %v2394_v42 }
 0x1d1   : > { %2397 = vmatpush1.bf16.msra.mxu0 %v2396_v48 }
 0x1d2   : > { %2399 = vmatprep.subr.bf16.mxu0 %v2398_v49 }
 0x1d5   : > { %2401 = vmatpush1.bf16.msra.mxu0 %v2400_v54 }
 0x1d6   : > { %2403 = vmatprep.subr.bf16.mxu0 %v2402_v46 }
 0x1d9   : > { %2405 = vmatpush1.bf16.msra.mxu0 %v2404_v58 }
 0x1da   : > { %2407 = vmatprep.subr.bf16.mxu0 %v2406_v59 }
 0x1dd   : > { %2409 = vmatpush1.bf16.msra.mxu0 %v2408_v62 }
 0x1e0   : > { %1540 = vmatmul.mubr.f32.vlgmr.msra.gmra.mrb[2].mxu0 %v3056_v38 }
 0x1f3   : > { %v1115_v7 = vpop.f32.mrb[0].mxu0 }
 0x1f4   : > { %v2411_v8 = vadd.f32 %v1115_v7, %v974_v5  ;;  %v1117_v9 = vpop.f32.mrb[1].mxu0 }
 0x1f5   : > { %v2413_v10 = vadd.f32 %v1117_v9, %v976_v29 }
 0x1f6   : > { %v1552_v20 = vmul.f32 0.70710677, %v2411_v8  ;;  %v1546_v40 = vmul.f32 0.5, %v2411_v8 }
 0x1f7   : > { %v1553_v21 = vmul.f32 0.70710677, %v2413_v10  ;;  %v1547_v41 = vmul.f32 0.5, %v2413_v10 }
 0x1f8   : > { %2521 = verf.f32 %v1552_v20 }
 0x1f9   : > { %2523 = verf.f32 %v1553_v21 }
 0x202   : > { %v2522_v27 = vpop.eup %2521 }
 0x203   : > { %v2524_v30 = vpop.eup %2523  ;;  %v1564_v36 = vadd.f32 1.0, %v2522_v27  ;;  %v1651_v27 = vld [vmem:[#allocation10] sm:$0x3f] }
 0x204   : > { %v1565_v37 = vadd.f32 1.0, %v2524_v30  ;;  %v1656_v30 = vrot.slane %v1651_v27, %v3066_v1 }
 0x205   : > { %v1570_v44 = vmul.f32 %v1564_v36, %v1546_v40  ;;  %v1664_v36 = vrot.slane %v1651_v27, %v3074_v12 }
 0x206   : > { %v1571_v45 = vmul.f32 %v1565_v37, %v1547_v41  ;;  %v1668_v37 = vrot.slane %v1651_v27, %v3077_v14 }
 0x208   : > { %v1576_v50 = vadd.f32 %v1571_v45, %v1570_v44 }
 0x272   : > { %v1328_v38 = vpop.f32.mrb[2].mxu1 }
 0x273   : > { %v1330_v11 = vpop.f32.mrb[3].mxu1  ;;  %v2414_v15 = vadd.f32 %v1328_v38, %v888_v13 }
 0x274   : > { %v2415_v22 = vadd.f32 %v1330_v11, %v892_v18 }
 0x275   : > { %v1554_v16 = vmul.f32 0.70710677, %v2414_v15  ;;  %v1548_v47 = vmul.f32 0.5, %v2414_v15 }
 0x276   : > { %v1555_v6 = vmul.f32 0.70710677, %v2415_v22  ;;  %v1549_v51 = vmul.f32 0.5, %v2415_v22 }
 0x277   : > { %2525 = verf.f32 %v1554_v16 }
 0x278   : > { %2527 = verf.f32 %v1555_v6 }
 0x281   : > { %v2526_v34 = vpop.eup %2525 }
 0x282   : > { %v1566_v42 = vadd.f32 1.0, %v2526_v34  ;;  %v2528_v43 = vpop.eup %2527 }
 0x283   : > { %v1567_v49 = vadd.f32 1.0, %v2528_v43 }
 0x284   : > { %v1572_v48 = vmul.f32 %v1566_v42, %v1548_v47 }
 0x285   : > { %v1573_v52 = vmul.f32 %v1567_v49, %v1549_v51 }
 0x286   : > { %v1577_v53 = vadd.f32 %v1576_v50, %v1572_v48 }
 0x288   : > { %v1578_v59 = vadd.f32 %v1577_v53, %v1573_v52 }
 0x2b3   : > { %v1541_v28 = vpop.f32.mrb[2].mxu0 }
 0x2b4   : > { %v2416_v31 = vadd.f32 %v1541_v28, %v896_v25  ;;  %v1543_v32 = vpop.f32.mrb[3].mxu0 }
 0x2b5   : > { %v2417_v33 = vadd.f32 %v1543_v32, %v900_v26  ;;  %v1613_v26 = vld [vmem:[#allocation8] sm:$0x3f]  ;;  %v1660_v32 = vrot.slane %v1651_v27, %v3068_v19 }
 0x2b6   : > { %v1556_v35 = vmul.f32 0.70710677, %v2416_v31  ;;  %v1550_v17 = vmul.f32 0.5, %v2416_v31  ;;  %v1618_v28 = vrot.slane %v1613_v26, %v3066_v1  ;;  %v1622_v31 = vrot.slane %v1613_v26, %v3068_v19 }
 0x2b7   : > { %v1557_v39 = vmul.f32 0.70710677, %v2417_v33  ;;  %v1551_v56 = vmul.f32 0.5, %v2417_v33  ;;  %v1626_v33 = vrot.slane %v1613_v26, %v3074_v12  ;;  %v1630_v34 = vrot.slane %v1613_v26, %v3077_v14 }
 0x2b8   : > { %2529 = verf.f32 %v1556_v35  ;;  %v1638_v40 = vrot.slane %v1613_v26, %v3082_v24  ;;  %v1672_v19 = vrot.slane %v1651_v27, %v3080_v23 }
 0x2b9   : > { %2531 = verf.f32 %v1557_v39  ;;  %v1634_v39 = vrot.slane %v1613_v26, %v3080_v23 }
 0x2c2   : > { %v2530_v54 = vpop.eup %2529 }
 0x2c3   : > { %v2532_v46 = vpop.eup %2531  ;;  %v1568_v55 = vadd.f32 1.0, %v2530_v54 }
 0x2c4   : > { %v1569_v57 = vadd.f32 1.0, %v2532_v46 }
 0x2c5   : > { %v1574_v58 = vmul.f32 %v1568_v55, %v1550_v17 }
 0x2c6   : > { %v1575_v60 = vmul.f32 %v1569_v57, %v1551_v56 }
 0x2c7   : > { %v1579_v61 = vadd.f32 %v1578_v59, %v1574_v58 }
 0x2c9   : > { %v1580_v62 = vadd.f32 %v1579_v61, %v1575_v60 }
 0x2cb   : > { %1581 = vadd.xlane.f32.xlu0 %v1580_v62 }
 0x358   : > { %v1582_v63 = vpop.xlane.xlu0 %1581 }
 0x359   : > { %v1584_v0 = vmul.f32 0.0013020834, %v1582_v63 }
 0x35b   : > { %v1585_v2 = vsub.f32 %v1570_v44, %v1584_v0  ;;  %v1586_v3 = vsub.f32 %v1571_v45, %v1584_v0  ;;  %v1587_v4 = vsub.f32 %v1572_v48, %v1584_v0  ;;  %v1588_v5 = vsub.f32 %v1573_v52, %v1584_v0 }
 0x35c   : > { %v1589_v8 = vsub.f32 %v1574_v58, %v1584_v0  ;;  %v1590_v38 = vsub.f32 %v1575_v60, %v1584_v0  ;;  %v1676_v44 = vrot.slane %v1651_v27, %v3082_v24 }
 0x35d   : > { %v1591_v29 = vmul.f32 %v1585_v2, %v1585_v2  ;;  %v1592_v7 = vmul.f32 %v1586_v3, %v1586_v3  ;;  %v1593_v9 = vmul.f32 %v1587_v4, %v1587_v4  ;;  %v1594_v11 = vmul.f32 %v1588_v5, %v1588_v5 }
 0x35e   : > { %v1595_v15 = vmul.f32 %v1589_v8, %v1589_v8  ;;  %v1596_v20 = vmul.f32 %v1590_v38, %v1590_v38 }
 0x35f   : > { %v1597_v10 = vadd.f32 %v1592_v7, %v1591_v29 }
 0x361   : > { %v1598_v13 = vadd.f32 %v1597_v10, %v1593_v9 }
 0x363   : > { %v1599_v18 = vadd.f32 %v1598_v13, %v1594_v11 }
 0x365   : > { %v1600_v21 = vadd.f32 %v1599_v18, %v1595_v15 }
 0x367   : > { %v1601_v16 = vadd.f32 %v1600_v21, %v1596_v20 }
 0x369   : > { %1602 = vadd.xlane.f32.xlu0 %v1601_v16 }
 0x3f6   : > { %v1603_v22 = vpop.xlane.xlu0 %1602 }
 0x3f7   : > { %v1604_v6 = vmul.f32 0.0013020834, %v1603_v22 }
 0x3f9   : > { %v1605_v25 = vadd.f32 1e-12, %v1604_v6 }
 0x3fb   : > { %2533 = vrsqrt.f32 %v1605_v25 }
 0x405   : > { %v2534_v35 = vpop.eup %2533 }
 0x406   : > { %v1607_v1 = vmul.f32 %v2534_v35, %v1585_v2  ;;  %v1608_v41 = vmul.f32 %v2534_v35, %v1586_v3  ;;  %v1609_v42 = vmul.f32 %v2534_v35, %v1587_v4  ;;  %v1610_v43 = vmul.f32 %v2534_v35, %v1588_v5 }
 0x407   : > { %v1611_v45 = vmul.f32 %v2534_v35, %v1589_v8  ;;  %v1612_v47 = vmul.f32 %v2534_v35, %v1590_v38 }
 0x408   : > { %v1645_v48 = vmul.f32 %v1618_v28, %v1607_v1  ;;  %v1646_v12 = vmul.f32 %v1622_v31, %v1608_v41  ;;  %v1647_v49 = vmul.f32 %v1626_v33, %v1609_v42  ;;  %v1648_v14 = vmul.f32 %v1630_v34, %v1610_v43 }
 0x409   : > { %v1649_v50 = vmul.f32 %v1634_v39, %v1611_v45  ;;  %v1650_v51 = vmul.f32 %v1638_v40, %v1612_v47 }
 0x40a   : > { %v1683_v52 = vadd.f32 %v1656_v30, %v1645_v48  ;;  %v1684_v53 = vadd.f32 %v1660_v32, %v1646_v12  ;;  %v1685_v54 = vadd.f32 %v1664_v36, %v1647_v49  ;;  %v1686_v23 = vadd.f32 %v1668_v37, %v1648_v14 }
 0x40b   : > { %v1687_v46 = vadd.f32 %v1672_v19, %v1649_v50  ;;  %v1688_v24 = vadd.f32 %v1676_v44, %v1650_v51 }
 0x40c   : > { %1689 = vst [vmem:[%s292_s6] sm:$0xff] %v1683_v52  ;;  %1690 = vst [vmem:[%s292_s6 + $0x8] sm:$0xff] %v1684_v53 }
 0x40d   : > { %1691 = vst [vmem:[%s292_s6 + $0x10] sm:$0xff] %v1685_v54  ;;  %1692 = vst [vmem:[%s292_s6 + $0x18] sm:$0xff] %v1686_v23 }
 0x40e   : > { %1693 = vst [vmem:[%s292_s6 + $0x20] sm:$0xff] %v1687_v46  ;;  %1694 = vst [vmem:[%s292_s6 + $0x28] sm:$0xff] %v1688_v24 }
 0x40f   : > { %2695 = shalt.err (!%p2692_p0)
}
 0x410   : > { %s2696_s14 = scalar_lea.hbm %s3104_s24, 768  ;;  %s2700_s11 = scalar_lea.hbm %s3153_s5, 1536 }
 0x411   : > { %p2697_p2 = scmp.ne.s32.totalorder %s3104_s24, %s2696_s14  ;;  %p2701_p10 = scmp.lt.u32.totalorder %s3104_s24, %s3153_s5 }
 0x412   : > { %p2702_p11 = scmp.lt.u32.totalorder %s2700_s11, %s2696_s14  ;;  %p2704_p5 = scmp.lt.u32.totalorder %s2696_s14, %s3104_s24 }
 0x413   : > { %p2698_p8 = pnand %p2697_p2, %p3170_p6 }
 0x414   : > { %p2703_p1 = por %p2702_p11, %p2701_p10 }
 0x415   : > { %p2699_p4 = pneg %p2698_p8 }
 0x416   : > { %p2705_p7 = por %p2704_p5, %p2703_p1 }
 0x418   : > { %p2706_p9 = pnand %p2705_p7, %p2699_p4 }
 0x41a   : > { %2709 = shalt.err (!%p2706_p9)
}
 0x41b   : > { %2450 = dma.vmem_to_hbm [thread:$0]  (%p3170_p6), %s3106_s12, 768, %s3104_s24, %s1696_s17  }
 0x41c PF: > { %s1722_s25 = sand.u32 1, %s2744_s18   ;;  %p3171_p12 = scmp.ne.s32.totalorder %s3163_s9, 0 }
 0x41d   : > { %p3172_p3 = scmp.ge.s32.totalorder %s2756_s21, 2  ;;  %s1723_s6 = scalar_lea.sflag [#allocation4], %s1722_s25 }
 0x41f   : > { %p2470_p13 = pnand %p3172_p3, %p3171_p12 }
 0x421   : > { %2739 = dma.done.wait (!%p2470_p13), %s1723_s6, 768  }
 0x422   : > { %2741 = vsyncadd (!%p2470_p13), %s1723_s6, 4294966528  ;;  %p20_p0 = scmp.ge.s32.totalorder %s2936_s28, 4   ;;  %s3173_s18 = smov %s2748_s19 }
 0x423   : > { %s3174_s19 = smov %s2752_s20  ;;  %s3175_s20 = smov %s2947_s27 }
 0x424   : > { %s3176_s21 = smov %s2936_s28  ;;  %22 = sbr.rel (!%p20_p0) target bundleno = 7 (0x7), region = 101 }
 0x42b   :  { %1728 = vsyncpa [#allocation3], 1 }
 0x42c   :  { %1730 = vsyncpa [#allocation3 + $0x1], 1 }
 0x42d   :  { %1731 = vsyncpa [#allocation6], 1 }
 0x42e   :  { %1732 = vsyncpa [#allocation9], 1 }
 0x42f   :  { %1733 = vsyncpa [#allocation4], 1 }
 0x430   :  { %1735 = vsyncpa [#allocation4 + $0x1], 1 }

</bundles_post_ra>
